<compile_context>
chip_gen: v5e
topology: v5e:2x2
jax: 0.10.0
libtpu: 0.0.40
codegen_flags: <defaults>
</compile_context>

<pallas_src>
import numpy as np
import jax
import jax.numpy as jnp
from jax.experimental import pallas as pl
from jax.experimental.pallas import tpu as pltpu

# ---------------------------------------------------------------------------
# ImplicitNetwork hyper-parameters (small, deterministic, consistent with ctor)
# ---------------------------------------------------------------------------
FEATURE_VECTOR_SIZE = 8
D_IN = 3
D_OUT = 1
HIDDEN_DIMS = [32, 32, 32, 32]
SKIP_IN = (2,)
GEOMETRIC_INIT = True
BIAS = 1.0
WEIGHT_NORM = True
INSIDE_OUTSIDE = False

OUT_TOTAL = D_OUT + FEATURE_VECTOR_SIZE      # 9
HID = 32                                     # packed channel width (>= every real dim)
XPROJ = 2 * HID                              # merged x-projection width (layer0 | skip)

SOFTPLUS_BETA = 100.0
SOFTPLUS_INV_BETA = 1.0 / SOFTPLUS_BETA
SOFTPLUS_THRESHOLD = 20.0                    # PyTorch nn.Softplus default

# bf16 operands = native MXU rate on v5e/v6e/v7x; set to jnp.float32 for
# bit-tight parity with the f32 reference (slower multi-pass f32 MXU).
MATMUL_DTYPE = jnp.bfloat16
MAX_ROW_TILE = 2048


# ---------------------------------------------------------------------------
# Deterministic parameter construction (mirrors __init__ geometric init).
# weight_norm(dim=0) initializes g = ||v||, so the effective weight equals v
# exactly at init -> no divide needed (avoids the all-zero-row NaN hazard).
# ---------------------------------------------------------------------------
def init_params(key):
    dims = [D_IN] + HIDDEN_DIMS + [D_OUT + FEATURE_VECTOR_SIZE]
    num_layers = len(dims)
    params = []
    for l in range(num_layers - 1):
        out_dim = dims[l + 1] - dims[0] if (l + 1) in SKIP_IN else dims[l + 1]
        in_dim = dims[l]
        key, wk = jax.random.split(key)
        if GEOMETRIC_INIT:
            if l == num_layers - 2:
                if not INSIDE_OUTSIDE:
                    mean, bias_val = np.sqrt(np.pi) / np.sqrt(in_dim), -BIAS
                else:
                    mean, bias_val = -np.sqrt(np.pi) / np.sqrt(in_dim), BIAS
                w = mean + 1e-4 * jax.random.normal(wk, (out_dim, in_dim), jnp.float32)
                b = jnp.full((out_dim,), bias_val, jnp.float32)
            else:
                std = np.sqrt(2.0) / np.sqrt(out_dim)
                w = std * jax.random.normal(wk, (out_dim, in_dim), jnp.float32)
                b = jnp.zeros((out_dim,), jnp.float32)
        else:
            bound = 1.0 / np.sqrt(in_dim)
            w = jax.random.uniform(wk, (out_dim, in_dim), jnp.float32, -bound, bound)
            b = jnp.zeros((out_dim,), jnp.float32)
        # WEIGHT_NORM: effective weight == v at init (g = ||v||); keep w as-is.
        params.append((w, b))
    return params, dims, num_layers


# ---------------------------------------------------------------------------
# One-time packing: transpose + zero-pad all weights to 32-wide slabs.
#  * x-projections merged: lanes [0:32] = W0^T, lanes [32:64] = W2_x^T/sqrt(2)
#  * skip layer (l=2) weight split into h-part / input-part, both pre-scaled
#    by 1/sqrt(2) so the kernel never concatenates.
#  * padding is EXACT zero (also after the bf16 cast) so padded channels of h
#    (which carry softplus(0)=log(2)/100) are annihilated by the next matmul.
# ---------------------------------------------------------------------------
def pack_params(params, dims):
    (w0, b0), (w1, b1), (w2, b2), (w3, b3), (w4, b4) = params
    skip_h = dims[2] - dims[0]                     # 29 = layer-1 output channels
    inv_sqrt2 = np.float32(1.0 / np.sqrt(2.0))

    def pad2(a, rows, cols):
        a = jnp.asarray(a, jnp.float32)
        return jnp.zeros((rows, cols), jnp.float32).at[:a.shape[0], :a.shape[1]].set(a)

    def pad_b(bv):
        bv = jnp.asarray(bv, jnp.float32)
        return jnp.zeros((1, HID), jnp.float32).at[0, :bv.shape[0]].set(bv)

    # merged x-projection weight: (3, 64)
    wx = jnp.zeros((D_IN, XPROJ), jnp.float32)
    wx = wx.at[:, :HID].set(pad2(w0.T, D_IN, HID))                          # layer 0
    wx = wx.at[:, HID:].set(pad2((w2[:, skip_h:] * inv_sqrt2).T, D_IN, HID))  # skip-x

    # hidden-layer weights: (4, 32, 32)
    wh = jnp.stack([
        pad2(w1.T, HID, HID),                           # layer 1 (32 x 29 -> pad cols)
        pad2((w2[:, :skip_h] * inv_sqrt2).T, HID, HID),  # layer 2 h-part (29 x 32 -> pad rows)
        pad2(w3.T, HID, HID),                           # layer 3
        pad2(w4.T, HID, HID),                           # layer 4 (32 x 9 -> pad cols)
    ])

    bb = jnp.stack([pad_b(b0), pad_b(b1), pad_b(b2), pad_b(b3), pad_b(b4)])  # (5,1,32) f32
    return wx.astype(MATMUL_DTYPE), wh.astype(MATMUL_DTYPE), bb


# ---------------------------------------------------------------------------
# Softplus(beta=100, threshold=20) -- matches torch.nn.Softplus semantics, f32.
# ---------------------------------------------------------------------------
def _softplus100(y):
    z = SOFTPLUS_BETA * y
    z_safe = jnp.minimum(z, SOFTPLUS_THRESHOLD)            # avoid exp overflow
    sp = jnp.log1p(jnp.exp(z_safe)) * SOFTPLUS_INV_BETA
    return jnp.where(z > SOFTPLUS_THRESHOLD, y, sp)


# ---------------------------------------------------------------------------
# Fused Pallas kernel: full 5-layer MLP on one row tile, activations resident.
# ---------------------------------------------------------------------------
def _fused_mlp_kernel(x_ref, wx_ref, wh_ref, b_ref, o_ref):
    # x_ref: (TN, 3) f32   wx_ref: (3, 64) bf16   wh_ref: (4, 32, 32) bf16
    # b_ref: (5, 1, 32) f32   o_ref: (TN, 9) f32
    x = x_ref[...].astype(MATMUL_DTYPE)

    # Single K=3 matmul feeds both x-projections; lane-slice the two halves.
    xw = jnp.dot(x, wx_ref[...], preferred_element_type=jnp.float32)     # (TN, 64) f32

    # layer 0
    h = _softplus100(xw[:, :HID] + b_ref[0])
    # layer 1
    h = _softplus100(jnp.dot(h.astype(MATMUL_DTYPE), wh_ref[0],
                             preferred_element_type=jnp.float32) + b_ref[1])
    # layer 2 (skip): (cat([h, x], 1) / sqrt(2)) @ W2^T + b2 with W2 pre-split
    # and pre-scaled by 1/sqrt(2); zero-padded weight rows annihilate the
    # softplus(0) leakage sitting in h's padded channels.
    h = _softplus100(jnp.dot(h.astype(MATMUL_DTYPE), wh_ref[1],
                             preferred_element_type=jnp.float32) + xw[:, HID:] + b_ref[2])
    # layer 3
    h = _softplus100(jnp.dot(h.astype(MATMUL_DTYPE), wh_ref[2],
                             preferred_element_type=jnp.float32) + b_ref[3])
    # layer 4 (no activation)
    h = jnp.dot(h.astype(MATMUL_DTYPE), wh_ref[3],
                preferred_element_type=jnp.float32) + b_ref[4]

    o_ref[...] = h[:, :OUT_TOTAL].astype(o_ref.dtype)


# ---------------------------------------------------------------------------
# Tiling policy: large tiles (amortize ~0.35 us/grid-step), >= 2 grid steps so
# the 'parallel' row axis can shard across v7x's two TensorCores.  Rows are
# zero-padded in the wrapper, so the tile need not divide N.
# ---------------------------------------------------------------------------
def _choose_row_tile(n):
    steps = max(2, pl.cdiv(n, MAX_ROW_TILE))
    tile = pl.cdiv(pl.cdiv(n, steps), 8) * 8
    return max(8, min(tile, MAX_ROW_TILE))


def implicit_network_forward(x, packed, row_tile=None):
    """x: (N, 3) f32 -> (N, 9) f32.  Single fused pallas_call."""
    wx, wh, bb = packed
    n = x.shape[0]
    if row_tile is None:
        row_tile = _choose_row_tile(n)
    n_pad = row_tile * pl.cdiv(n, row_tile)
    if n_pad != n:
        x = jnp.pad(x, ((0, n_pad - n), (0, 0)))       # padded rows sliced off below

    out = pl.pallas_call(
        _fused_mlp_kernel,
        out_shape=jax.ShapeDtypeStruct((n_pad, OUT_TOTAL), jnp.float32),
        grid_spec=pltpu.PrefetchScalarGridSpec(
            num_scalar_prefetch=0,
            grid=(n_pad // row_tile,),
            in_specs=[
                pl.BlockSpec((row_tile, D_IN), lambda i: (i, 0)),
                # constant index maps: weights/biases DMA'd into VMEM once.
                pl.BlockSpec((D_IN, XPROJ), lambda i: (0, 0)),
                pl.BlockSpec((4, HID, HID), lambda i: (0, 0, 0)),
                pl.BlockSpec((5, 1, HID), lambda i: (0, 0, 0)),
            ],
            out_specs=pl.BlockSpec((row_tile, OUT_TOTAL), lambda i: (i, 0)),
        ),
        compiler_params=pltpu.CompilerParams(
            dimension_semantics=("parallel",),
            vmem_limit_bytes=32 * 1024 * 1024,          # headroom over v5e's 16 MiB default
        ),
    )(x, wx, wh, bb)
    return out[:n]


# ---------------------------------------------------------------------------
# References.
#   reference_forward      : pure-f32 mirror of the PyTorch forward.
#   packed_math_reference  : plain-JAX mirror of the kernel's packed bf16 math
#                            (tight structural check of packing/skip/padding).
# ---------------------------------------------------------------------------
def reference_forward(x, params, num_layers):
    inp = x
    h = x
    for l in range(num_layers - 1):
        w, b = params[l]
        if l in SKIP_IN:
            h = jnp.concatenate([h, inp], axis=1) / np.sqrt(2.0)
        h = h @ w.T + b
        if l < num_layers - 2:
            h = _softplus100(h)
    return h


def packed_math_reference(x, packed):
    wx, wh, bb = packed
    xm = x.astype(MATMUL_DTYPE)
    xw = jnp.dot(xm, wx, preferred_element_type=jnp.float32)
    h = _softplus100(xw[:, :HID] + bb[0])
    h = _softplus100(jnp.dot(h.astype(MATMUL_DTYPE), wh[0],
                             preferred_element_type=jnp.float32) + bb[1])
    h = _softplus100(jnp.dot(h.astype(MATMUL_DTYPE), wh[1],
                             preferred_element_type=jnp.float32) + xw[:, HID:] + bb[2])
    h = _softplus100(jnp.dot(h.astype(MATMUL_DTYPE), wh[2],
                             preferred_element_type=jnp.float32) + bb[3])
    h = jnp.dot(h.astype(MATMUL_DTYPE), wh[3],
                preferred_element_type=jnp.float32) + bb[4]
    return h[:, :OUT_TOTAL]


if __name__ == "__main__":
    key = jax.random.PRNGKey(0)
    pkey, xkey = jax.random.split(key)

    params, dims, num_layers = init_params(pkey)
    packed = pack_params(params, dims)

    # End-to-end tolerance: tight for f32 operands, bf16-operand tolerance else.
    if MATMUL_DTYPE == jnp.float32:
        e2e_tol = dict(rtol=1e-4, atol=1e-5)
    else:
        e2e_tol = dict(rtol=5e-2, atol=1e-1)

    # --- run 1: N a multiple of the tile --------------------------------------
    N = 256
    x = jax.random.normal(xkey, (N, D_IN), jnp.float32)
    out = jax.block_until_ready(implicit_network_forward(x, packed))
    assert out.shape == (N, OUT_TOTAL), out.shape
    assert np.all(np.isfinite(np.asarray(out)))

    # tight structural check (same packed bf16 math, plain JAX)
    ref_packed = jax.block_until_ready(packed_math_reference(x, packed))
    np.testing.assert_allclose(np.asarray(out), np.asarray(ref_packed),
                               rtol=1e-3, atol=1e-3)
    # end-to-end check vs the f32 PyTorch-equivalent reference
    ref_f32 = jax.block_until_ready(reference_forward(x, params, num_layers))
    np.testing.assert_allclose(np.asarray(out), np.asarray(ref_f32), **e2e_tol)

    # --- run 2: awkward N exercises the pad-rows / slice-output path ----------
    N2 = 1000
    x2 = jax.random.normal(jax.random.PRNGKey(1), (N2, D_IN), jnp.float32)
    out2 = jax.block_until_ready(implicit_network_forward(x2, packed))
    assert out2.shape == (N2, OUT_TOTAL), out2.shape
    ref2 = jax.block_until_ready(reference_forward(x2, params, num_layers))
    np.testing.assert_allclose(np.asarray(out2), np.asarray(ref2), **e2e_tol)

    print("KERNEL_OK")
</pallas_src>

<mosaic_0001>
module attributes {stable_mosaic.version = 11 : i64} {
  func.func @_fused_mlp_kernel(%arg0: i32, %arg1: memref<128x3xf32, #tpu.memory_space<vmem>>, %arg2: memref<3x64xbf16, #tpu.memory_space<vmem>>, %arg3: memref<4x32x32xbf16, #tpu.memory_space<vmem>>, %arg4: memref<5x1x32xf32, #tpu.memory_space<vmem>>, %arg5: memref<128x9xf32, #tpu.memory_space<vmem>>) attributes {dimension_semantics = [#tpu.dimension_semantics<parallel>], iteration_bounds = array<i64: 2>, scalar_prefetch = 0 : i64, scratch_operands = 0 : i64, tpu.core_type = #tpu.core_type<tc>, window_params = [{transform_indices = @transform_0, window_bounds = array<i64: 128, 3>}, {pipeline_mode = #tpu.pipeline_mode<synchronous>, transform_indices = @transform_1, window_bounds = array<i64: 3, 64>}, {pipeline_mode = #tpu.pipeline_mode<synchronous>, transform_indices = @transform_2, window_bounds = array<i64: 4, 32, 32>}, {pipeline_mode = #tpu.pipeline_mode<synchronous>, transform_indices = @transform_3, window_bounds = array<i64: 5, 1, 32>}, {transform_indices = @transform_4, window_bounds = array<i64: 128, 9>}]} {
    %c0 = arith.constant 0 : index
    %c0_0 = arith.constant 0 : index
    %0 = vector.load %arg1[%c0, %c0_0] : memref<128x3xf32, #tpu.memory_space<vmem>>, vector<128x3xf32>
    %1 = arith.truncf %0 : vector<128x3xf32> to vector<128x3xbf16>
    %c0_1 = arith.constant 0 : index
    %c0_2 = arith.constant 0 : index
    %2 = vector.load %arg2[%c0_1, %c0_2] : memref<3x64xbf16, #tpu.memory_space<vmem>>, vector<3x64xbf16>
    %cst = arith.constant dense<0.000000e+00> : vector<128x64xf32>
    %3 = tpu.matmul %1, %2, %cst {dimension_numbers = #tpu.dot_dimension_numbers<[1], [0], [0], [1], [0, 0, 1, 1], [], []>} : vector<128x3xbf16>, vector<3x64xbf16>, vector<128x64xf32> -> vector<128x64xf32>
    %4 = vector.extract_strided_slice %3 {offsets = [0, 0], sizes = [128, 32], strides = [1, 1]} : vector<128x64xf32> to vector<128x32xf32>
    %c0_3 = arith.constant 0 : index
    %c0_4 = arith.constant 0 : index
    %c0_5 = arith.constant 0 : index
    %5 = vector.load %arg4[%c0_3, %c0_4, %c0_5] : memref<5x1x32xf32, #tpu.memory_space<vmem>>, vector<1x1x32xf32>
    %6 = vector.shape_cast %5 : vector<1x1x32xf32> to vector<1x32xf32>
    %7 = vector.broadcast %6 : vector<1x32xf32> to vector<128x32xf32>
    %8 = arith.addf %4, %7 : vector<128x32xf32>
    %cst_6 = arith.constant 1.000000e+02 : f32
    %9 = vector.broadcast %cst_6 : f32 to vector<128x32xf32>
    %10 = arith.mulf %9, %8 : vector<128x32xf32>
    %cst_7 = arith.constant 2.000000e+01 : f32
    %11 = vector.broadcast %cst_7 : f32 to vector<128x32xf32>
    %12 = arith.minimumf %10, %11 : vector<128x32xf32>
    %13 = math.exp %12 : vector<128x32xf32>
    %14 = math.log1p %13 : vector<128x32xf32>
    %cst_8 = arith.constant 0.00999999977 : f32
    %15 = vector.broadcast %cst_8 : f32 to vector<128x32xf32>
    %16 = arith.mulf %14, %15 : vector<128x32xf32>
    %cst_9 = arith.constant 2.000000e+01 : f32
    %17 = vector.broadcast %cst_9 : f32 to vector<128x32xf32>
    %18 = arith.cmpf ogt, %10, %17 : vector<128x32xf32>
    %19 = arith.select %18, %8, %16 : vector<128x32xi1>, vector<128x32xf32>
    %20 = arith.truncf %19 : vector<128x32xf32> to vector<128x32xbf16>
    %c0_10 = arith.constant 0 : index
    %c0_11 = arith.constant 0 : index
    %c0_12 = arith.constant 0 : index
    %21 = vector.load %arg3[%c0_10, %c0_11, %c0_12] : memref<4x32x32xbf16, #tpu.memory_space<vmem>>, vector<1x32x32xbf16>
    %22 = vector.shape_cast %21 : vector<1x32x32xbf16> to vector<32x32xbf16>
    %cst_13 = arith.constant dense<0.000000e+00> : vector<128x32xf32>
    %23 = tpu.matmul %20, %22, %cst_13 {dimension_numbers = #tpu.dot_dimension_numbers<[1], [0], [0], [1], [0, 0, 1, 1], [], []>} : vector<128x32xbf16>, vector<32x32xbf16>, vector<128x32xf32> -> vector<128x32xf32>
    %c1 = arith.constant 1 : index
    %c0_14 = arith.constant 0 : index
    %c0_15 = arith.constant 0 : index
    %24 = vector.load %arg4[%c1, %c0_14, %c0_15] : memref<5x1x32xf32, #tpu.memory_space<vmem>>, vector<1x1x32xf32>
    %25 = vector.shape_cast %24 : vector<1x1x32xf32> to vector<1x32xf32>
    %26 = vector.broadcast %25 : vector<1x32xf32> to vector<128x32xf32>
    %27 = arith.addf %23, %26 : vector<128x32xf32>
    %cst_16 = arith.constant 1.000000e+02 : f32
    %28 = vector.broadcast %cst_16 : f32 to vector<128x32xf32>
    %29 = arith.mulf %28, %27 : vector<128x32xf32>
    %cst_17 = arith.constant 2.000000e+01 : f32
    %30 = vector.broadcast %cst_17 : f32 to vector<128x32xf32>
    %31 = arith.minimumf %29, %30 : vector<128x32xf32>
    %32 = math.exp %31 : vector<128x32xf32>
    %33 = math.log1p %32 : vector<128x32xf32>
    %cst_18 = arith.constant 0.00999999977 : f32
    %34 = vector.broadcast %cst_18 : f32 to vector<128x32xf32>
    %35 = arith.mulf %33, %34 : vector<128x32xf32>
    %cst_19 = arith.constant 2.000000e+01 : f32
    %36 = vector.broadcast %cst_19 : f32 to vector<128x32xf32>
    %37 = arith.cmpf ogt, %29, %36 : vector<128x32xf32>
    %38 = arith.select %37, %27, %35 : vector<128x32xi1>, vector<128x32xf32>
    %39 = arith.truncf %38 : vector<128x32xf32> to vector<128x32xbf16>
    %c1_20 = arith.constant 1 : index
    %c0_21 = arith.constant 0 : index
    %c0_22 = arith.constant 0 : index
    %40 = vector.load %arg3[%c1_20, %c0_21, %c0_22] : memref<4x32x32xbf16, #tpu.memory_space<vmem>>, vector<1x32x32xbf16>
    %41 = vector.shape_cast %40 : vector<1x32x32xbf16> to vector<32x32xbf16>
    %cst_23 = arith.constant dense<0.000000e+00> : vector<128x32xf32>
    %42 = tpu.matmul %39, %41, %cst_23 {dimension_numbers = #tpu.dot_dimension_numbers<[1], [0], [0], [1], [0, 0, 1, 1], [], []>} : vector<128x32xbf16>, vector<32x32xbf16>, vector<128x32xf32> -> vector<128x32xf32>
    %43 = vector.extract_strided_slice %3 {offsets = [0, 32], sizes = [128, 32], strides = [1, 1]} : vector<128x64xf32> to vector<128x32xf32>
    %44 = arith.addf %42, %43 : vector<128x32xf32>
    %c2 = arith.constant 2 : index
    %c0_24 = arith.constant 0 : index
    %c0_25 = arith.constant 0 : index
    %45 = vector.load %arg4[%c2, %c0_24, %c0_25] : memref<5x1x32xf32, #tpu.memory_space<vmem>>, vector<1x1x32xf32>
    %46 = vector.shape_cast %45 : vector<1x1x32xf32> to vector<1x32xf32>
    %47 = vector.broadcast %46 : vector<1x32xf32> to vector<128x32xf32>
    %48 = arith.addf %44, %47 : vector<128x32xf32>
    %cst_26 = arith.constant 1.000000e+02 : f32
    %49 = vector.broadcast %cst_26 : f32 to vector<128x32xf32>
    %50 = arith.mulf %49, %48 : vector<128x32xf32>
    %cst_27 = arith.constant 2.000000e+01 : f32
    %51 = vector.broadcast %cst_27 : f32 to vector<128x32xf32>
    %52 = arith.minimumf %50, %51 : vector<128x32xf32>
    %53 = math.exp %52 : vector<128x32xf32>
    %54 = math.log1p %53 : vector<128x32xf32>
    %cst_28 = arith.constant 0.00999999977 : f32
    %55 = vector.broadcast %cst_28 : f32 to vector<128x32xf32>
    %56 = arith.mulf %54, %55 : vector<128x32xf32>
    %cst_29 = arith.constant 2.000000e+01 : f32
    %57 = vector.broadcast %cst_29 : f32 to vector<128x32xf32>
    %58 = arith.cmpf ogt, %50, %57 : vector<128x32xf32>
    %59 = arith.select %58, %48, %56 : vector<128x32xi1>, vector<128x32xf32>
    %60 = arith.truncf %59 : vector<128x32xf32> to vector<128x32xbf16>
    %c2_30 = arith.constant 2 : index
    %c0_31 = arith.constant 0 : index
    %c0_32 = arith.constant 0 : index
    %61 = vector.load %arg3[%c2_30, %c0_31, %c0_32] : memref<4x32x32xbf16, #tpu.memory_space<vmem>>, vector<1x32x32xbf16>
    %62 = vector.shape_cast %61 : vector<1x32x32xbf16> to vector<32x32xbf16>
    %cst_33 = arith.constant dense<0.000000e+00> : vector<128x32xf32>
    %63 = tpu.matmul %60, %62, %cst_33 {dimension_numbers = #tpu.dot_dimension_numbers<[1], [0], [0], [1], [0, 0, 1, 1], [], []>} : vector<128x32xbf16>, vector<32x32xbf16>, vector<128x32xf32> -> vector<128x32xf32>
    %c3 = arith.constant 3 : index
    %c0_34 = arith.constant 0 : index
    %c0_35 = arith.constant 0 : index
    %64 = vector.load %arg4[%c3, %c0_34, %c0_35] : memref<5x1x32xf32, #tpu.memory_space<vmem>>, vector<1x1x32xf32>
    %65 = vector.shape_cast %64 : vector<1x1x32xf32> to vector<1x32xf32>
    %66 = vector.broadcast %65 : vector<1x32xf32> to vector<128x32xf32>
    %67 = arith.addf %63, %66 : vector<128x32xf32>
    %cst_36 = arith.constant 1.000000e+02 : f32
    %68 = vector.broadcast %cst_36 : f32 to vector<128x32xf32>
    %69 = arith.mulf %68, %67 : vector<128x32xf32>
    %cst_37 = arith.constant 2.000000e+01 : f32
    %70 = vector.broadcast %cst_37 : f32 to vector<128x32xf32>
    %71 = arith.minimumf %69, %70 : vector<128x32xf32>
    %72 = math.exp %71 : vector<128x32xf32>
    %73 = math.log1p %72 : vector<128x32xf32>
    %cst_38 = arith.constant 0.00999999977 : f32
    %74 = vector.broadcast %cst_38 : f32 to vector<128x32xf32>
    %75 = arith.mulf %73, %74 : vector<128x32xf32>
    %cst_39 = arith.constant 2.000000e+01 : f32
    %76 = vector.broadcast %cst_39 : f32 to vector<128x32xf32>
    %77 = arith.cmpf ogt, %69, %76 : vector<128x32xf32>
    %78 = arith.select %77, %67, %75 : vector<128x32xi1>, vector<128x32xf32>
    %79 = arith.truncf %78 : vector<128x32xf32> to vector<128x32xbf16>
    %c3_40 = arith.constant 3 : index
    %c0_41 = arith.constant 0 : index
    %c0_42 = arith.constant 0 : index
    %80 = vector.load %arg3[%c3_40, %c0_41, %c0_42] : memref<4x32x32xbf16, #tpu.memory_space<vmem>>, vector<1x32x32xbf16>
    %81 = vector.shape_cast %80 : vector<1x32x32xbf16> to vector<32x32xbf16>
    %cst_43 = arith.constant dense<0.000000e+00> : vector<128x32xf32>
    %82 = tpu.matmul %79, %81, %cst_43 {dimension_numbers = #tpu.dot_dimension_numbers<[1], [0], [0], [1], [0, 0, 1, 1], [], []>} : vector<128x32xbf16>, vector<32x32xbf16>, vector<128x32xf32> -> vector<128x32xf32>
    %c4 = arith.constant 4 : index
    %c0_44 = arith.constant 0 : index
    %c0_45 = arith.constant 0 : index
    %83 = vector.load %arg4[%c4, %c0_44, %c0_45] : memref<5x1x32xf32, #tpu.memory_space<vmem>>, vector<1x1x32xf32>
    %84 = vector.shape_cast %83 : vector<1x1x32xf32> to vector<1x32xf32>
    %85 = vector.broadcast %84 : vector<1x32xf32> to vector<128x32xf32>
    %86 = arith.addf %82, %85 : vector<128x32xf32>
    %87 = vector.extract_strided_slice %86 {offsets = [0, 0], sizes = [128, 9], strides = [1, 1]} : vector<128x32xf32> to vector<128x9xf32>
    %c0_46 = arith.constant 0 : index
    %c0_47 = arith.constant 0 : index
    %88 = vector.load %arg5[%c0_46, %c0_47] : memref<128x9xf32, #tpu.memory_space<vmem>>, vector<128x9xf32>
    tpu.vector_store %arg5[%c0_46, %c0_47], %87 {strides = array<i32>} : memref<128x9xf32, #tpu.memory_space<vmem>>, vector<128x9xf32>,
    return
  }
  func.func @transform_0(%arg0: i32) -> (i32, i32) {
    %c0_i32 = arith.constant 0 : i32
    %c0_i32_0 = arith.constant 0 : i32
    return %arg0, %c0_i32 : i32, i32
  }
  func.func @transform_1(%arg0: i32) -> (i32, i32) {
    %c0_i32 = arith.constant 0 : i32
    %c0_i32_0 = arith.constant 0 : i32
    %c0_i32_1 = arith.constant 0 : i32
    return %c0_i32, %c0_i32_0 : i32, i32
  }
  func.func @transform_2(%arg0: i32) -> (i32, i32, i32) {
    %c0_i32 = arith.constant 0 : i32
    %c0_i32_0 = arith.constant 0 : i32
    %c0_i32_1 = arith.constant 0 : i32
    %c0_i32_2 = arith.constant 0 : i32
    return %c0_i32, %c0_i32_0, %c0_i32_1 : i32, i32, i32
  }
  func.func @transform_3(%arg0: i32) -> (i32, i32, i32) {
    %c0_i32 = arith.constant 0 : i32
    %c0_i32_0 = arith.constant 0 : i32
    %c0_i32_1 = arith.constant 0 : i32
    %c0_i32_2 = arith.constant 0 : i32
    return %c0_i32, %c0_i32_0, %c0_i32_1 : i32, i32, i32
  }
  func.func @transform_4(%arg0: i32) -> (i32, i32) {
    %c0_i32 = arith.constant 0 : i32
    %c0_i32_0 = arith.constant 0 : i32
    return %arg0, %c0_i32 : i32, i32
  }
}

</mosaic_0001>

<bundles_post_ra>
// kernel: tpu_custom_call.1
= control target key start
LH: loop header
LB: loop body
LE: loop exit
PB: predicated region body
PF: predicated region fallthrough
CT: control target
= control target key end

     0   :  { %s2333_s15 = smov 0   ;;  %s3163_s0 = inlined_call_operand.vmem [shape: f32[256,3], index: 0, kind: input, shape index: {}]   ;;  %s3164_s1 = inlined_call_operand.vmem [shape: bf16[3,64], index: 1, kind: input, shape index: {}]   ;;  %s3165_s2 = inlined_call_operand.vmem [shape: bf16[4,32,32], index: 2, kind: input, shape index: {}]   ;;  %s3166_s3 = inlined_call_operand.vmem [shape: f32[5,1,32], index: 3, kind: input, shape index: {}]   ;;  %s3167_s4 = inlined_call_operand.vmem [shape: f32[256,9], index: 4, kind: output, shape index: {}]  }
   0x1 LB: > { %s1917_s16 = sadd.s32 4294967295, %s2304_s15   ;;  %p1921_p0 = scmp.ge.s32.totalorder %s2304_s15, 1  ;;  %s2304_s15 = sphi %s2333_s15, %s14_s15  }
   0x2   : > { %p163_p1 = scmp.lt.s32.totalorder %s2304_s15, 3 }
   0x4   : > { %p164_p2 = pnand %p1921_p0, %p163_p1 }
   0x5   : > { %s1922_s19 = sshll.u32 (!%p164_p2), %s1917_s16, 4  ;;  %s2307_s26 = smov (!%p164_p2), 96  }
   0x6   : > { %167 = sbr.rel (%p164_p2) target bundleno = 946 (0x3b2), region = 36  ;;  %p190_p3 = scmp.lt.s32.totalorder (!%p164_p2), %s1922_s19, 31 }
   0xb   : > { %v226_v0 = vld [vmem:[%s3164_s1] sm:$0x3]  ;;  %vm252_vm0 = vcmask 1040384   ;;  %vm253_vm1 = vcmask 1041408   ;;  %v2306_v1 = vmov 65535   ;;  %s3187_s19 = smov (!%p190_p3, %s1922_s19), 31 }
   0xc   : > { %v254_v2 = vsel %vm252_vm0, 4294967295, %v2306_v1  ;;  %s1923_s20 = sshll.u32 %s3187_s19, 3  ;;  %vm227_vm2 = vcmask 23552   ;;  %v2363_v29 = vld [vmem:[%s3166_s3] ss:$0 sm:$0xff]  ;;  %v2017_v33 = vld [vmem:[%s3165_s2 + $0x8] sm:$0xff] }
   0xd   : > { %v255_v3 = vsel %vm253_vm1, %v254_v2, 0  ;;  %s193_s23 = scalar_lea.vmem %s3163_s0, %s1923_s20  ;;  %v2016_v37 = vld [vmem:[%s3165_s2] sm:$0xff]  ;;  %vm613_vm5 = vcmask 261120   ;;  %s3126_s30 = scalar_lea.vmem %s3167_s4, %s1923_s20 }
   0xe   : > { %v257_v4 = vand.u32 %v255_v3, %v226_v0  ;;  %v202_v5 = vld [vmem:[%s193_s23] sm:$0xff]  ;;  %v203_v6 = vld [vmem:[%s193_s23 + $0x8] sm:$0xff]  ;;  %v204_v17 = vld [vmem:[%s193_s23 + $0x10] sm:$0xff] }
   0xf   : > { %v206_v7 = vld [vmem:[%s193_s23 + $0x20] sm:$0xff]  ;;  %v218_v8 = vpack.c.bf16 %v203_v6, %v202_v5  ;;  %v207_v9 = vld [vmem:[%s193_s23 + $0x28] sm:$0xff]  ;;  %v205_v18 = vld [vmem:[%s193_s23 + $0x18] sm:$0xff] }
  0x10   : > { %266 = vmatpush.bf16.msra.mxu0 %v257_v4  ;;  %2024 = vmatpush.bf16.msra.mxu1 %v257_v4  ;;  %v220_v10 = vpack.c.bf16 %v207_v9, %v206_v7  ;;  %v210_v11 = vld [vmem:[%s193_s23 + $0x40] sm:$0xff]  ;;  %v211_v12 = vld [vmem:[%s193_s23 + $0x48] sm:$0xff]  ;;  %v208_v19 = vld [vmem:[%s193_s23 + $0x30] sm:$0xff]  ;;  %v219_v21 = vpack.c.bf16 %v205_v18, %v204_v17 }
  0x11   : > { %2025 = vmatpush.bf16.msra.mxu2 %v257_v4  ;;  %2026 = vmatpush.bf16.msra.mxu3 %v257_v4  ;;  %v222_v13 = vpack.c.bf16 %v211_v12, %v210_v11  ;;  %v214_v14 = vld [vmem:[%s193_s23 + $0x60] sm:$0xff]  ;;  %v215_v15 = vld [vmem:[%s193_s23 + $0x68] sm:$0xff]  ;;  %v209_v20 = vld [vmem:[%s193_s23 + $0x38] sm:$0xff] }
  0x12   : > { %v224_v16 = vpack.c.bf16 %v215_v15, %v214_v14  ;;  %v212_v22 = vld [vmem:[%s193_s23 + $0x50] sm:$0xff]  ;;  %v213_v23 = vld [vmem:[%s193_s23 + $0x58] sm:$0xff]  ;;  %v221_v24 = vpack.c.bf16 %v209_v20, %v208_v19 }
  0x13   : > { %1926 = vmatmul.msk.bf16.vlgmr.msra.gmra.mxu0 %vm227_vm2, %v218_v8  ;;  %1928 = vmatmul.msk.bf16.vlgmr.msra.gmra.mxu1 %vm227_vm2, %v220_v10  ;;  %v216_v25 = vld [vmem:[%s193_s23 + $0x70] sm:$0xff]  ;;  %v217_v26 = vld [vmem:[%s193_s23 + $0x78] sm:$0xff]  ;;  %v223_v27 = vpack.c.bf16 %v213_v23, %v212_v22 }
  0x14   : > { %1930 = vmatmul.msk.bf16.vlgmr.msra.gmra.mxu2 %vm227_vm2, %v222_v13  ;;  %1932 = vmatmul.msk.bf16.vlgmr.msra.gmra.mxu3 %vm227_vm2, %v224_v16  ;;  %v225_v28 = vpack.c.bf16 %v217_v26, %v216_v25 }
  0x15   : > { %644 = vmatpush.bf16.msrb.mxu1 %v2017_v33 }
  0x19   : > { %645 = vmatpush.bf16.msrb.mxu1 %v2016_v37 }
  0x23   : > { %1927 = vmatmul.msk.bf16.gmra.mxu0 %vm227_vm2, %v219_v21  ;;  %1929 = vmatmul.msk.bf16.gmra.mxu1 %vm227_vm2, %v221_v24 }
  0x24   : > { %1931 = vmatmul.msk.bf16.gmra.mxu2 %vm227_vm2, %v223_v27  ;;  %1933 = vmatmul.msk.bf16.gmra.mxu3 %vm227_vm2, %v225_v28 }
  0x90   : > { %v268_v30 = vpop.f32.mrf.mxu0  ;;  %v278_v32 = vpop.f32.mrf.mxu1 }
  0x91   : > { %v2366_v31 = vadd.f32 %v2363_v29, %v268_v30  ;;  %984 = vrot.lane.b32.xlu0 %v268_v30, %s2307_s26  ;;  %992 = vrot.lane.b32.xlu2 %v278_v32, %s2307_s26  ;;  %v2378_v36 = vadd.f32 %v2363_v29, %v278_v32 }
  0x93   : > { %v2374_v34 = vmul.f32 100.0, %v2366_v31  ;;  %v2388_v43 = vmul.f32 100.0, %v2378_v36 }
  0x95   : > { %v344_v35 = vmin.f32 %v2374_v34, 20.0  ;;  %v348_v47 = vmin.f32 %v2388_v43, 20.0  ;;  %vm552_vm4 = vcmp.gt.f32.partialorder %v2374_v34, 20.0  ;;  %vm556_vm8 = vcmp.gt.f32.partialorder %v2388_v43, 20.0 }
  0x97   : > { %v360_v38 = vmul.f32 1.442695, %v344_v35  ;;  %v288_v42 = vpop.f32.mrf.mxu2  ;;  %v368_v56 = vmul.f32 1.442695, %v348_v47  ;;  %v298_v10 = vpop.f32.mrf.mxu3 }
  0x98   : > { %v270_v39 = vpop.f32.mrf.mxu0  ;;  %v280_v41 = vpop.f32.mrf.mxu1  ;;  %v2391_v44 = vadd.f32 %v2363_v29, %v288_v42  ;;  %v2446_v22 = vadd.f32 %v2363_v29, %v298_v10 }
  0x99   : > { %2042 = vpow2.f32 %v360_v38  ;;  %v2384_v40 = vadd.f32 %v2363_v29, %v270_v39  ;;  %986 = vrot.lane.b32.xlu0 %v270_v39, %s2307_s26  ;;  %994 = vrot.lane.b32.xlu2 %v280_v41, %s2307_s26  ;;  %v2400_v51 = vadd.f32 %v2363_v29, %v280_v41 }
  0x9a   : > { %v2433_v13 = vmul.f32 100.0, %v2391_v44 }
  0x9b   : > { %v2395_v45 = vmul.f32 100.0, %v2384_v40  ;;  %v2412_v59 = vmul.f32 100.0, %v2400_v51 }
  0x9c   : > { %v352_v30 = vmin.f32 %v2433_v13, 20.0  ;;  %vm560_vm0 = vcmp.gt.f32.partialorder %v2433_v13, 20.0 }
  0x9d   : > { %v345_v46 = vmin.f32 %v2395_v45, 20.0  ;;  %v349_v2 = vmin.f32 %v2412_v59, 20.0  ;;  %vm553_vm7 = vcmp.gt.f32.partialorder %v2395_v45, 20.0  ;;  %vm557_vm15 = vcmp.gt.f32.partialorder %v2412_v59, 20.0 }
  0x9f   : > { %v2043_v48 = vpop.eup %2042  ;;  %v362_v49 = vmul.f32 1.442695, %v345_v46  ;;  %v290_v55 = vpop.f32.mrf.mxu2  ;;  %v370_v17 = vmul.f32 1.442695, %v349_v2 }
  0xa0   : > { %v392_v50 = vadd.f32 1.0, %v2043_v48  ;;  %v273_v52 = vpop.f32.mrf.mxu0  ;;  %v283_v54 = vpop.f32.mrf.mxu1  ;;  %v395_v58 = vmul.f32 -0.5, %v2043_v48  ;;  %v398_v8 = vand.u32 2147483647, %v2043_v48  ;;  %v2426_v9 = vadd.f32 %v2363_v29, %v290_v55 }
  0xa1   : > { %2044 = vpow2.f32 %v362_v49  ;;  %v2403_v53 = vadd.f32 %v2363_v29, %v273_v52  ;;  %988 = vrot.lane.b32.xlu1 %v273_v52, %s2307_s26  ;;  %996 = vrot.lane.b32.xlu0 %v283_v54, %s2307_s26  ;;  %v2417_v5 = vadd.f32 %v2363_v29, %v283_v54 }
  0xa2   : > { %2046 = vlog2.f32 %v392_v50  ;;  %1000 = vrot.lane.b32.xlu2 %v288_v42, %s2307_s26  ;;  %v396_v0 = vadd.f32 1.0, %v395_v58  ;;  %vm2448_vm3 = vcmp.lt.f32.partialorder %v398_v8, 0.0004427343  ;;  %v2453_v25 = vmul.f32 100.0, %v2426_v9 }
  0xa3   : > { %v2409_v57 = vmul.f32 100.0, %v2403_v53  ;;  %2048 = vpow2.f32 %v368_v56  ;;  %v2442_v19 = vmul.f32 100.0, %v2417_v5  ;;  %v376_v50 = vmul.f32 1.442695, %v352_v30 }
  0xa4   : > { %v397_v16 = vmul.f32 %v2043_v48, %v396_v0  ;;  %v353_v47 = vmin.f32 %v2453_v25, 20.0  ;;  %v2469_v48 = vpop.f32.mrf.mxu3  ;;  %vm561_vm1 = vcmp.gt.f32.partialorder %v2453_v25, 20.0 }
  0xa5   : > { %v346_v60 = vmin.f32 %v2409_v57, 20.0  ;;  %v350_v41 = vmin.f32 %v2442_v19, 20.0  ;;  %vm554_vm9 = vcmp.gt.f32.partialorder %v2409_v57, 20.0 }
  0xa7   : > { %v2045_v61 = vpop.eup %2044  ;;  %v364_v62 = vmul.f32 1.442695, %v346_v60  ;;  %v2423_v7 = vpop.f32.mrf.mxu2  ;;  %v372_v56 = vmul.f32 1.442695, %v350_v41  ;;  %v2485_v60 = vadd.f32 %v2363_v29, %v2469_v48 }
  0xa8   : > { %v2047_v63 = vpop.eup %2046  ;;  %v401_v1 = vadd.f32 1.0, %v2045_v61  ;;  %v275_v3 = vpop.f32.mrf.mxu0  ;;  %v404_v4 = vmul.f32 -0.5, %v2045_v61  ;;  %v2437_v14 = vadd.f32 %v2363_v29, %v2423_v7  ;;  %v407_v24 = vand.u32 2147483647, %v2045_v61 }
  0xa9   : > { %2050 = vpow2.f32 %v364_v62  ;;  %v2420_v6 = vadd.f32 %v2363_v29, %v275_v3  ;;  %990 = vrot.lane.b32.xlu1 %v275_v3, %s2307_s26  ;;  %1002 = vrot.lane.b32.xlu0 %v290_v55, %s2307_s26  ;;  %v394_v11 = vmul.f32 0.6931472, %v2047_v63  ;;  %v2439_v15 = vpop.eup %2048  ;;  %v285_v21 = vpop.f32.mrf.mxu1  ;;  %v378_v63 = vmul.f32 1.442695, %v353_v47 }
  0xaa   : > { %2052 = vlog2.f32 %v401_v1  ;;  %v405_v18 = vadd.f32 1.0, %v404_v4  ;;  %v428_v32 = vadd.f32 1.0, %v2439_v15  ;;  %v2463_v35 = vadd.f32 %v2363_v29, %v285_v21 }
  0xab   : > { %v2430_v12 = vmul.f32 100.0, %v2420_v6  ;;  %v400_v27 = vsel %vm2448_vm3, %v397_v16, %v394_v11  ;;  %vm408_vm6 = vcmp.lt.f32.partialorder %v407_v24, 0.0004427343  ;;  %v2481_v58 = vmul.f32 100.0, %v2437_v14 }
  0xac   : > { %v406_v39 = vmul.f32 %v2045_v61, %v405_v18  ;;  %v536_v46 = vmul.f32 0.01, %v400_v27  ;;  %v2475_v54 = vmul.f32 100.0, %v2463_v35  ;;  %v431_v45 = vmul.f32 -0.5, %v2439_v15  ;;  %v303_v23 = vpop.f32.mrf.mxu3 }
  0xad   : > { %v347_v20 = vmin.f32 %v2430_v12, 20.0  ;;  %v2494_v3 = vmul.f32 100.0, %v2446_v22  ;;  %v434_v16 = vand.u32 2147483647, %v2439_v15  ;;  %vm555_vm12 = vcmp.gt.f32.partialorder %v2430_v12, 20.0 }
  0xae   : > { %v568_v61 = vsel %vm552_vm4, %v2366_v31, %v536_v46  ;;  %v351_v8 = vmin.f32 %v2475_v54, 20.0  ;;  %v432_v11 = vadd.f32 1.0, %v431_v45  ;;  %vm562_vm3 = vcmp.gt.f32.partialorder %v2481_v58, 20.0 }
  0xaf   : > { %v2455_v26 = vpop.eup %2050  ;;  %v366_v28 = vmul.f32 1.442695, %v347_v20  ;;  %v295_v42 = vpop.f32.mrf.mxu2  ;;  %v356_v27 = vmin.f32 %v2494_v3, 20.0  ;;  %vm2526_vm10 = vcmp.lt.f32.partialorder %v434_v16, 0.0004427343 }
  0xb0   : > { %v2053_v33 = vpop.eup %2052  ;;  %v410_v37 = vadd.f32 1.0, %v2455_v26  ;;  %1006 = vrot.lane.b32.xlu2 %v295_v42, %s2307_s26  ;;  %v2478_v55 = vadd.f32 %v2363_v29, %v295_v42  ;;  %v413_v0 = vmul.f32 -0.5, %v2455_v26  ;;  %v416_v24 = vand.u32 2147483647, %v2455_v26 }
  0xb1   : > { %v403_v38 = vmul.f32 0.6931472, %v2053_v33  ;;  %2054 = vpow2.f32 %v366_v28  ;;  %998 = vrot.lane.b32.xlu1 %v285_v21, %s2307_s26  ;;  %1008 = vrot.lane.b32.xlu0 %v298_v10, %s2307_s26  ;;  %v2508_v21 = vmul.f32 100.0, %v2485_v60  ;;  %v374_v30 = vmul.f32 1.442695, %v351_v8 }
  0xb2   : > { %2056 = vpow2.f32 %v370_v17  ;;  %v2500_v10 = vmul.f32 100.0, %v2478_v55  ;;  %v414_v18 = vadd.f32 1.0, %v413_v0  ;;  %v2516_v33 = vadd.f32 %v2363_v29, %v303_v23 }
  0xb3   : > { %v409_v49 = vsel %vm408_vm6, %v406_v39, %v403_v38  ;;  %2058 = vlog2.f32 %v428_v32  ;;  %v433_v39 = vmul.f32 %v2439_v15, %v432_v11  ;;  %vm2532_vm11 = vcmp.lt.f32.partialorder %v416_v24, 0.0004427343 }
  0xb4   : > { %v537_v52 = vmul.f32 0.01, %v409_v49  ;;  %2060 = vlog2.f32 %v410_v37  ;;  %v415_v46 = vmul.f32 %v2455_v26, %v414_v18  ;;  %v357_v49 = vmin.f32 %v2508_v21, 20.0  ;;  %v305_v11 = vpop.f32.mrf.mxu3 }
  0xb5   : > { %2062 = vpow2.f32 %v376_v50  ;;  %v384_v45 = vmul.f32 1.442695, %v356_v27  ;;  %v2570_v50 = vadd.f32 %v2363_v29, %v305_v11  ;;  %vm563_vm6 = vcmp.gt.f32.partialorder %v2500_v10, 20.0 }
  0xb6   : > { %v569_v62 = vsel %vm553_vm7, %v2384_v40, %v537_v52  ;;  %2064 = vpow2.f32 %v372_v56  ;;  %v354_v40 = vmin.f32 %v2481_v58, 20.0 }
  0xb7   : > { %v2055_v1 = vpop.eup %2054  ;;  %v584_v2 = vpack.c.bf16 %v569_v62, %v568_v61  ;;  %2066 = vpow2.f32 %v378_v63 }
  0xb8   : > { %v2496_v4 = vpop.eup %2056  ;;  %v419_v34 = vadd.f32 1.0, %v2055_v1  ;;  %v422_v20 = vmul.f32 -0.5, %v2055_v1  ;;  %1012 = vrot.lane.b32.xlu2 %v303_v23, %s2307_s26  ;;  %v380_v37 = vmul.f32 1.442695, %v354_v40  ;;  %v425_v56 = vand.u32 2147483647, %v2055_v1 }
  0xb9   : > { %v2059_v31 = vpop.eup %2058  ;;  %1943 = vmatmul.msk.bf16.vlgmr.msrb.gmra.mxu1 %vm613_vm5, %v584_v2  ;;  %1004 = vrot.lane.b32.xlu1 %v2423_v7, %s2307_s26  ;;  %v437_v28 = vadd.f32 1.0, %v2496_v4  ;;  %v355_v7 = vmin.f32 %v2500_v10, 20.0  ;;  %v440_v41 = vmul.f32 -0.5, %v2496_v4  ;;  %v443_v8 = vand.u32 2147483647, %v2496_v4 }
  0xba   : > { %v2061_v17 = vpop.eup %2060  ;;  %2068 = vlog2.f32 %v419_v34  ;;  %v430_v38 = vmul.f32 0.6931472, %v2059_v31  ;;  %v423_v47 = vadd.f32 1.0, %v422_v20  ;;  %v386_v40 = vmul.f32 1.442695, %v357_v49  ;;  %1014 = vrot.lane.b32.xlu0 %v305_v11, %s2307_s26 }
  0xbb   : > { %v412_v32 = vmul.f32 0.6931472, %v2061_v17  ;;  %v2520_v42 = vpop.eup %2062  ;;  %2070 = vlog2.f32 %v437_v28  ;;  %v382_v26 = vmul.f32 1.442695, %v355_v7  ;;  %v441_v2 = vadd.f32 1.0, %v440_v41 }
  0xbc   : > { %v2530_v52 = vpop.eup %2064  ;;  %2072 = vpow2.f32 %v374_v30  ;;  %v436_v0 = vsel %vm2526_vm10, %v433_v39, %v430_v38  ;;  %v424_v31 = vmul.f32 %v2055_v1, %v423_v47  ;;  %v464_v16 = vadd.f32 1.0, %v2520_v42 }
  0xbd   : > { %v2536_v61 = vpop.eup %2066  ;;  %v418_v62 = vsel %vm2532_vm11, %v415_v46, %v412_v32  ;;  %2074 = vpow2.f32 %v380_v37  ;;  %vm426_vm13 = vcmp.lt.f32.partialorder %v425_v56, 0.0004427343  ;;  %v467_v18 = vmul.f32 -0.5, %v2520_v42 }
  0xbe   : > { %v538_v17 = vmul.f32 0.01, %v418_v62  ;;  %2076 = vpow2.f32 %v384_v45  ;;  %v540_v23 = vmul.f32 0.01, %v436_v0  ;;  %v446_v24 = vadd.f32 1.0, %v2530_v52 }
  0xbf   : > { %2078 = vpow2.f32 %v382_v26  ;;  %v442_v1 = vmul.f32 %v2496_v4, %v441_v2  ;;  %vm2551_vm14 = vcmp.lt.f32.partialorder %v443_v8, 0.0004427343  ;;  %v449_v7 = vmul.f32 -0.5, %v2530_v52 }
  0xc0   : > { %v2069_v63 = vpop.eup %2068  ;;  %2080 = vlog2.f32 %v464_v16  ;;  %v468_v32 = vadd.f32 1.0, %v467_v18  ;;  %v473_v37 = vadd.f32 1.0, %v2536_v61  ;;  %v570_v39 = vsel %vm554_vm9, %v2403_v53, %v538_v17 }
  0xc1   : > { %1010 = vrot.lane.b32.xlu1 %v2469_v48, %s2307_s26  ;;  %v421_v34 = vmul.f32 0.6931472, %v2069_v63  ;;  %v2071_v27 = vpop.eup %2070  ;;  %2082 = vpow2.f32 %v386_v40  ;;  %v470_v41 = vand.u32 2147483647, %v2520_v42  ;;  %v476_v46 = vmul.f32 -0.5, %v2536_v61 }
  0xc2   : > { %v2555_v30 = vpop.eup %2072  ;;  %v439_v49 = vmul.f32 0.6931472, %v2071_v27  ;;  %2084 = vlog2.f32 %v446_v24  ;;  %v2577_v53 = vsel %vm556_vm8, %v2378_v36, %v540_v23  ;;  %v452_v29 = vand.u32 2147483647, %v2530_v52 }
  0xc3   : > { %v427_v20 = vsel %vm426_vm13, %v424_v31, %v421_v34  ;;  %v2075_v38 = vpop.eup %2074  ;;  %v455_v12 = vadd.f32 1.0, %v2555_v30  ;;  %2086 = vlog2.f32 %v473_v37  ;;  %v469_v56 = vmul.f32 %v2520_v42, %v468_v32 }
  0xc4   : > { %v539_v48 = vmul.f32 0.01, %v427_v20  ;;  %v2572_v57 = vpop.eup %2076  ;;  %v477_v45 = vadd.f32 1.0, %v476_v46  ;;  %v482_v26 = vadd.f32 1.0, %v2075_v38  ;;  %v450_v36 = vadd.f32 1.0, %v449_v7 }
  0xc5   : > { %v2079_v15 = vpop.eup %2078  ;;  %vm2587_vm2 = vcmp.lt.f32.partialorder %v470_v41, 0.0004427343  ;;  %v479_v63 = vand.u32 2147483647, %v2536_v61  ;;  %v485_v0 = vmul.f32 -0.5, %v2075_v38  ;;  %v445_v8 = vsel %vm2551_vm14, %v442_v1, %v439_v49 }
  0xc6   : > { %v571_v4 = vsel %vm555_vm12, %v2420_v6, %v539_v48  ;;  %v2580_v6 = vmul.f32 100.0, %v2516_v33  ;;  %v2081_v43 = vpop.eup %2080  ;;  %v2597_v34 = vmul.f32 100.0, %v2570_v50  ;;  %2088 = vlog2.f32 %v482_v26 }
  0xc7   : > { %v585_v47 = vpack.c.bf16 %v571_v4, %v570_v39  ;;  %v2592_v2 = vpop.eup %2082  ;;  %v466_v42 = vmul.f32 0.6931472, %v2081_v43  ;;  %v458_v40 = vmul.f32 -0.5, %v2555_v30  ;;  %v486_v11 = vadd.f32 1.0, %v485_v0 }
  0xc8   : > { %v358_v31 = vmin.f32 %v2580_v6, 20.0  ;;  %v491_v16 = vadd.f32 1.0, %v2079_v15  ;;  %v2085_v17 = vpop.eup %2084  ;;  %v478_v20 = vmul.f32 %v2536_v61, %v477_v45  ;;  %v488_v23 = vand.u32 2147483647, %v2075_v38 }
  0xc9   : > { %1944 = vmatmul.msk.bf16.gmra.mxu1 %vm613_vm5, %v585_v47  ;;  %v472_v18 = vsel %vm2587_vm2, %v469_v56, %v466_v42  ;;  %v494_v24 = vmul.f32 -0.5, %v2079_v15  ;;  %v2087_v27 = vpop.eup %2086  ;;  %v541_v48 = vmul.f32 0.01, %v445_v8  ;;  %vm2605_vm4 = vcmp.lt.f32.partialorder %v479_v63, 0.0004427343 }
  0xca   : > { %v544_v28 = vmul.f32 0.01, %v472_v18  ;;  %2090 = vlog2.f32 %v491_v16  ;;  %v359_v7 = vmin.f32 %v2597_v34, 20.0  ;;  %v2612_v32 = vmul.f32 %v2530_v52, %v450_v36 }
  0xcb   : > { %v475_v37 = vmul.f32 0.6931472, %v2087_v27  ;;  %v495_v39 = vadd.f32 1.0, %v494_v24  ;;  %v388_v61 = vmul.f32 1.442695, %v358_v31  ;;  %2092 = vlog2.f32 %v455_v12 }
  0xcc   : > { %v487_v4 = vmul.f32 %v2075_v38, %v486_v11  ;;  %v497_v41 = vand.u32 2147483647, %v2079_v15  ;;  %v2089_v46 = vpop.eup %2088  ;;  %vm2616_vm7 = vcmp.lt.f32.partialorder %v488_v23, 0.0004427343  ;;  %v500_v56 = vadd.f32 1.0, %v2572_v57 }
  0xcd   : > { %v481_v47 = vsel %vm2605_vm4, %v478_v20, %v475_v37  ;;  %v509_v45 = vadd.f32 1.0, %v2592_v2  ;;  %v573_v26 = vsel %vm557_vm15, %v2400_v51, %v541_v48  ;;  %v2628_v38 = vsel %vm560_vm0, %v2391_v44, %v544_v28 }
  0xce   : > { %v545_v43 = vmul.f32 0.01, %v481_v47  ;;  %v484_v12 = vmul.f32 0.6931472, %v2089_v46  ;;  %v390_v36 = vmul.f32 1.442695, %v359_v7  ;;  %v496_v63 = vmul.f32 %v2079_v15, %v495_v39 }
  0xcf   : > { %v461_v62 = vand.u32 2147483647, %v2555_v30  ;;  %2094 = vlog2.f32 %v500_v56  ;;  %vm498_vm8 = vcmp.lt.f32.partialorder %v497_v41, 0.0004427343  ;;  %v459_v59 = vadd.f32 1.0, %v458_v40 }
  0xd0   : > { %v2091_v0 = vpop.eup %2090  ;;  %v2634_v8 = vsel %vm561_vm1, %v2426_v9, %v545_v43  ;;  %v490_v51 = vsel %vm2616_vm7, %v487_v4, %v484_v12  ;;  %2096 = vlog2.f32 %v509_v45  ;;  %v586_v15 = vpack.c.bf16 %v573_v26, %v2577_v53 }
  0xd1   : > { %v588_v44 = vpack.c.bf16 %v2634_v8, %v2628_v38  ;;  %v493_v13 = vmul.f32 0.6931472, %v2091_v0  ;;  %v546_v42 = vmul.f32 0.01, %v490_v51  ;;  %v2093_v31 = vpop.eup %2092  ;;  %2098 = vpow2.f32 %v388_v61  ;;  %v2019_v38 = vld [vmem:[%s3165_s2 + $0x18] sm:$0xff] }
  0xd2   : > { %v503_v11 = vmul.f32 -0.5, %v2572_v57  ;;  %v512_v9 = vmul.f32 -0.5, %v2592_v2  ;;  %2100 = vpow2.f32 %v390_v36  ;;  %v448_v25 = vmul.f32 0.6931472, %v2085_v17  ;;  %1062 = vmatpush.bf16.msrb.mxu2 %v2019_v38 }
  0xd3   : > { %vm2643_vm9 = vcmp.lt.f32.partialorder %v461_v62, 0.0004427343  ;;  %v499_v40 = vsel %vm498_vm8, %v496_v63, %v493_v13  ;;  %v2650_v20 = vsel %vm562_vm3, %v2437_v14, %v546_v42  ;;  %v457_v27 = vmul.f32 0.6931472, %v2093_v31 }
  0xd4   : > { %v547_v18 = vmul.f32 0.01, %v499_v40  ;;  %v504_v23 = vadd.f32 1.0, %v503_v11  ;;  %v513_v53 = vadd.f32 1.0, %v512_v9  ;;  %v460_v48 = vmul.f32 %v2555_v30, %v459_v59  ;;  %v2018_v40 = vld [vmem:[%s3165_s2 + $0x10] sm:$0xff] }
  0xd5   : > { %v2095_v24 = vpop.eup %2094  ;;  %v506_v17 = vand.u32 2147483647, %v2572_v57  ;;  %v515_v1 = vand.u32 2147483647, %v2592_v2  ;;  %vm564_vm12 = vcmp.gt.f32.partialorder %v2494_v3, 20.0  ;;  %vm565_vm14 = vcmp.gt.f32.partialorder %v2508_v21, 20.0 }
  0xd6   : > { %v2097_v28 = vpop.eup %2096  ;;  %v579_v7 = vsel %vm563_vm6, %v2478_v55, %v547_v18  ;;  %v502_v58 = vmul.f32 0.6931472, %v2095_v24  ;;  %v505_v14 = vmul.f32 %v2572_v57, %v504_v23  ;;  %v514_v37 = vmul.f32 %v2592_v2, %v513_v53  ;;  %1063 = vmatpush.bf16.msrb.mxu2 %v2018_v40 }
  0xd7   : > { %v589_v39 = vpack.c.bf16 %v579_v7, %v2650_v20  ;;  %vm507_vm10 = vcmp.lt.f32.partialorder %v506_v17, 0.0004427343  ;;  %v511_v61 = vmul.f32 0.6931472, %v2097_v28  ;;  %vm516_vm11 = vcmp.lt.f32.partialorder %v515_v1, 0.0004427343  ;;  %v2099_v30 = vpop.eup %2098 }
  0xd8   : > { %vm2665_vm13 = vcmp.lt.f32.partialorder %v452_v29, 0.0004427343  ;;  %v508_v55 = vsel %vm507_vm10, %v505_v14, %v502_v58  ;;  %v2101_v10 = vpop.eup %2100  ;;  %v463_v57 = vsel %vm2643_vm9, %v460_v48, %v457_v27  ;;  %vm559_vm15 = vcmp.gt.f32.partialorder %v2475_v54, 20.0 }
  0xd9   : > { %1945 = vmatmul.msk.bf16.gmra.mxu1 %vm613_vm5, %v586_v15  ;;  %v517_v2 = vsel %vm516_vm11, %v514_v37, %v511_v61  ;;  %v548_v41 = vmul.f32 0.01, %v508_v55  ;;  %v454_v3 = vsel %vm2665_vm13, %v2612_v32, %v448_v25  ;;  %v543_v29 = vmul.f32 0.01, %v463_v57 }
  0xda   : > { %v549_v46 = vmul.f32 0.01, %v517_v2  ;;  %v518_v56 = vadd.f32 1.0, %v2099_v30  ;;  %v527_v21 = vadd.f32 1.0, %v2101_v10  ;;  %v542_v45 = vmul.f32 0.01, %v454_v3 }
  0xdb   : > { %v580_v52 = vsel %vm564_vm12, %v2446_v22, %v548_v41  ;;  %vm558_vm0 = vcmp.gt.f32.partialorder %v2442_v19, 20.0  ;;  %v575_v26 = vsel %vm559_vm15, %v2463_v35, %v543_v29  ;;  %v521_v32 = vmul.f32 -0.5, %v2099_v30 }
  0xdc   : > { %v581_v47 = vsel %vm565_vm14, %v2485_v60, %v549_v46  ;;  %2102 = vlog2.f32 %v518_v56  ;;  %v574_v43 = vsel %vm558_vm0, %v2417_v5, %v542_v45  ;;  %v530_v12 = vmul.f32 -0.5, %v2101_v10 }
  0xdd   : > { %v590_v49 = vpack.c.bf16 %v581_v47, %v580_v52  ;;  %2104 = vlog2.f32 %v527_v21  ;;  %v587_v22 = vpack.c.bf16 %v575_v26, %v574_v43  ;;  %v522_v36 = vadd.f32 1.0, %v521_v32 }
  0xde   : > { %v531_v62 = vadd.f32 1.0, %v530_v12  ;;  %v524_v54 = vand.u32 2147483647, %v2099_v30  ;;  %v533_v63 = vand.u32 2147483647, %v2101_v10  ;;  %vm566_vm3 = vcmp.gt.f32.partialorder %v2580_v6, 20.0 }
  0xdf   : > { %v523_v59 = vmul.f32 %v2099_v30, %v522_v36  ;;  %vm567_vm4 = vcmp.gt.f32.partialorder %v2597_v34, 20.0  ;;  %v2696_v6 = vld [vmem:[%s3166_s3 + $0x1] ss:$0 sm:$0xff] }
  0xe0   : > { %v532_v19 = vmul.f32 %v2101_v10, %v531_v62  ;;  %vm525_vm1 = vcmp.lt.f32.partialorder %v524_v54, 0.0004427343  ;;  %vm534_vm2 = vcmp.lt.f32.partialorder %v533_v63, 0.0004427343 }
  0xe2   : > { %v2103_v60 = vpop.eup %2102 }
  0xe3   : > { %v2105_v0 = vpop.eup %2104  ;;  %v520_v51 = vmul.f32 0.6931472, %v2103_v60 }
  0xe4   : > { %v529_v13 = vmul.f32 0.6931472, %v2105_v0 }
  0xe5   : > { %v526_v5 = vsel %vm525_vm1, %v523_v59, %v520_v51 }
  0xe6   : > { %v535_v35 = vsel %vm534_vm2, %v532_v19, %v529_v13  ;;  %v550_v42 = vmul.f32 0.01, %v526_v5 }
  0xe7   : > { %v551_v31 = vmul.f32 0.01, %v535_v35 }
  0xe8   : > { %v582_v15 = vsel %vm566_vm3, %v2516_v33, %v550_v42 }
  0xe9   : > { %1946 = vmatmul.msk.bf16.gmra.mxu1 %vm613_vm5, %v587_v22  ;;  %v583_v11 = vsel %vm567_vm4, %v2570_v50, %v551_v31 }
  0xea   : > { %v591_v9 = vpack.c.bf16 %v583_v11, %v582_v15 }
  0xf9   : > { %1947 = vmatmul.msk.bf16.gmra.mxu1 %vm613_vm5, %v588_v44 }
 0x109   : > { %1948 = vmatmul.msk.bf16.gmra.mxu1 %vm613_vm5, %v589_v39 }
 0x119   : > { %1949 = vmatmul.msk.bf16.gmra.mxu1 %vm613_vm5, %v590_v49 }
 0x129   : > { %1950 = vmatmul.msk.bf16.gmra.mxu1 %vm613_vm5, %v591_v9 }
 0x136   : > { %v647_v33 = vpop.f32.mrf.mxu1 }
 0x137   : > { %v648_v50 = vadd.f32 %v2696_v6, %v647_v33 }
 0x139   : > { %v687_v34 = vmul.f32 100.0, %v648_v50 }
 0x13b   : > { %v703_v25 = vmin.f32 %v687_v34, 20.0  ;;  %vm911_vm8 = vcmp.gt.f32.partialorder %v687_v34, 20.0 }
 0x13d   : > { %v719_v16 = vmul.f32 1.442695, %v703_v25 }
 0x13e   : > { %v649_v8 = vpop.f32.mrf.mxu1 }
 0x13f   : > { %2106 = vpow2.f32 %v719_v16  ;;  %v650_v44 = vadd.f32 %v2696_v6, %v649_v8 }
 0x141   : > { %v688_v18 = vmul.f32 100.0, %v650_v44 }
 0x143   : > { %v704_v20 = vmin.f32 %v688_v18, 20.0  ;;  %vm912_vm9 = vcmp.gt.f32.partialorder %v688_v18, 20.0 }
 0x145   : > { %v2107_v23 = vpop.eup %2106  ;;  %v721_v53 = vmul.f32 1.442695, %v704_v20 }
 0x146   : > { %v751_v24 = vadd.f32 1.0, %v2107_v23  ;;  %v652_v27 = vpop.f32.mrf.mxu1  ;;  %v754_v1 = vmul.f32 -0.5, %v2107_v23  ;;  %v757_v4 = vand.u32 2147483647, %v2107_v23 }
 0x147   : > { %2108 = vpow2.f32 %v721_v53  ;;  %v2707_v48 = vadd.f32 %v2696_v6, %v652_v27 }
 0x148   : > { %2110 = vlog2.f32 %v751_v24  ;;  %v755_v39 = vadd.f32 1.0, %v754_v1  ;;  %vm758_vm6 = vcmp.lt.f32.partialorder %v757_v4, 0.0004427343 }
 0x149   : > { %v2710_v17 = vmul.f32 100.0, %v2707_v48 }
 0x14a   : > { %v756_v2 = vmul.f32 %v2107_v23, %v755_v39 }
 0x14b   : > { %v705_v28 = vmin.f32 %v2710_v17, 20.0  ;;  %vm913_vm12 = vcmp.gt.f32.partialorder %v2710_v17, 20.0 }
 0x14d   : > { %v2109_v7 = vpop.eup %2108  ;;  %v723_v37 = vmul.f32 1.442695, %v705_v28 }
 0x14e   : > { %v2111_v58 = vpop.eup %2110  ;;  %v760_v14 = vadd.f32 1.0, %v2109_v7  ;;  %v763_v61 = vmul.f32 -0.5, %v2109_v7  ;;  %v654_v30 = vpop.f32.mrf.mxu1  ;;  %v766_v46 = vand.u32 2147483647, %v2109_v7 }
 0x14f   : > { %v2714_v55 = vadd.f32 %v2696_v6, %v654_v30  ;;  %v753_v10 = vmul.f32 0.6931472, %v2111_v58 }
 0x150   : > { %2112 = vlog2.f32 %v760_v14  ;;  %v764_v41 = vadd.f32 1.0, %v763_v61  ;;  %vm767_vm7 = vcmp.lt.f32.partialorder %v766_v46, 0.0004427343 }
 0x151   : > { %2114 = vpow2.f32 %v723_v37  ;;  %v2717_v57 = vmul.f32 100.0, %v2714_v55  ;;  %v759_v52 = vsel %vm758_vm6, %v756_v2, %v753_v10 }
 0x152   : > { %v765_v21 = vmul.f32 %v2109_v7, %v764_v41  ;;  %v895_v26 = vmul.f32 0.01, %v759_v52 }
 0x153   : > { %v706_v3 = vmin.f32 %v2717_v57, 20.0  ;;  %vm914_vm13 = vcmp.gt.f32.partialorder %v2717_v57, 20.0 }
 0x154   : > { %v927_v62 = vsel %vm911_vm8, %v648_v50, %v895_v26 }
 0x155   : > { %v725_v47 = vmul.f32 1.442695, %v706_v3 }
 0x156   : > { %v2113_v29 = vpop.eup %2112  ;;  %v657_v45 = vpop.f32.mrf.mxu1 }
 0x157   : > { %v2115_v49 = vpop.eup %2114  ;;  %v762_v56 = vmul.f32 0.6931472, %v2113_v29  ;;  %2116 = vpow2.f32 %v725_v47  ;;  %v2721_v43 = vadd.f32 %v2696_v6, %v657_v45 }
 0x158   : > { %v769_v32 = vadd.f32 1.0, %v2115_v49  ;;  %v772_v63 = vmul.f32 -0.5, %v2115_v49  ;;  %v775_v15 = vand.u32 2147483647, %v2115_v49 }
 0x159   : > { %v768_v12 = vsel %vm767_vm7, %v765_v21, %v762_v56  ;;  %v2724_v36 = vmul.f32 100.0, %v2721_v43 }
 0x15a   : > { %v896_v22 = vmul.f32 0.01, %v768_v12  ;;  %2118 = vlog2.f32 %v769_v32  ;;  %v773_v42 = vadd.f32 1.0, %v772_v63  ;;  %vm776_vm10 = vcmp.lt.f32.partialorder %v775_v15, 0.0004427343 }
 0x15b   : > { %v707_v54 = vmin.f32 %v2724_v36, 20.0  ;;  %vm915_vm0 = vcmp.gt.f32.partialorder %v2724_v36, 20.0 }
 0x15c   : > { %v928_v60 = vsel %vm912_vm9, %v650_v44, %v896_v22  ;;  %v774_v50 = vmul.f32 %v2115_v49, %v773_v42 }
 0x15d   : > { %v943_v0 = vpack.c.bf16 %v928_v60, %v927_v62  ;;  %v2117_v51 = vpop.eup %2116  ;;  %v727_v59 = vmul.f32 1.442695, %v707_v54 }
 0x15e   : > { %v659_v19 = vpop.f32.mrf.mxu1  ;;  %v778_v13 = vadd.f32 1.0, %v2117_v51  ;;  %v781_v31 = vmul.f32 -0.5, %v2117_v51  ;;  %v784_v25 = vand.u32 2147483647, %v2117_v51 }
 0x15f   : > { %1963 = vmatmul.msk.bf16.vlgmr.msrb.gmra.mxu2 %vm613_vm5, %v943_v0  ;;  %2120 = vpow2.f32 %v727_v59  ;;  %v2729_v35 = vadd.f32 %v2696_v6, %v659_v19 }
 0x160   : > { %v2119_v5 = vpop.eup %2118  ;;  %2122 = vlog2.f32 %v778_v13  ;;  %v782_v34 = vadd.f32 1.0, %v781_v31  ;;  %vm785_vm11 = vcmp.lt.f32.partialorder %v784_v25, 0.0004427343 }
 0x161   : > { %v2732_v11 = vmul.f32 100.0, %v2729_v35  ;;  %v771_v9 = vmul.f32 0.6931472, %v2119_v5 }
 0x162   : > { %v783_v53 = vmul.f32 %v2117_v51, %v782_v34 }
 0x163   : > { %v708_v33 = vmin.f32 %v2732_v11, 20.0  ;;  %v777_v8 = vsel %vm776_vm10, %v774_v50, %v771_v9  ;;  %vm916_vm1 = vcmp.gt.f32.partialorder %v2732_v11, 20.0 }
 0x164   : > { %v897_v24 = vmul.f32 0.01, %v777_v8 }
 0x165   : > { %v2121_v16 = vpop.eup %2120  ;;  %v729_v38 = vmul.f32 1.442695, %v708_v33 }
 0x166   : > { %v2123_v44 = vpop.eup %2122  ;;  %v662_v40 = vpop.f32.mrf.mxu1  ;;  %v787_v18 = vadd.f32 1.0, %v2121_v16  ;;  %v790_v58 = vmul.f32 -0.5, %v2121_v16  ;;  %v929_v14 = vsel %vm913_vm12, %v2707_v48, %v897_v24  ;;  %v793_v46 = vand.u32 2147483647, %v2121_v16 }
 0x167   : > { %2124 = vpow2.f32 %v729_v38  ;;  %v2736_v20 = vadd.f32 %v2696_v6, %v662_v40  ;;  %v780_v23 = vmul.f32 0.6931472, %v2123_v44 }
 0x168   : > { %2126 = vlog2.f32 %v787_v18  ;;  %v791_v17 = vadd.f32 1.0, %v790_v58  ;;  %vm794_vm14 = vcmp.lt.f32.partialorder %v793_v46, 0.0004427343 }
 0x169   : > { %v2739_v27 = vmul.f32 100.0, %v2736_v20  ;;  %v786_v1 = vsel %vm785_vm11, %v783_v53, %v780_v23 }
 0x16a   : > { %v898_v28 = vmul.f32 0.01, %v786_v1  ;;  %v792_v52 = vmul.f32 %v2121_v16, %v791_v17 }
 0x16b   : > { %v709_v7 = vmin.f32 %v2739_v27, 20.0  ;;  %vm917_vm4 = vcmp.gt.f32.partialorder %v2739_v27, 20.0 }
 0x16c   : > { %v930_v37 = vsel %vm914_vm13, %v2714_v55, %v898_v28 }
 0x16d   : > { %v2125_v39 = vpop.eup %2124  ;;  %v731_v61 = vmul.f32 1.442695, %v709_v7  ;;  %v944_v30 = vpack.c.bf16 %v930_v37, %v929_v14 }
 0x16e   : > { %v2127_v4 = vpop.eup %2126  ;;  %v664_v10 = vpop.f32.mrf.mxu1  ;;  %v796_v2 = vadd.f32 1.0, %v2125_v39  ;;  %v799_v57 = vmul.f32 -0.5, %v2125_v39  ;;  %v802_v47 = vand.u32 2147483647, %v2125_v39 }
 0x16f   : > { %2128 = vpow2.f32 %v731_v61  ;;  %v2747_v41 = vadd.f32 %v2696_v6, %v664_v10  ;;  %1964 = vmatmul.msk.bf16.gmra.mxu2 %vm613_vm5, %v944_v30  ;;  %v789_v55 = vmul.f32 0.6931472, %v2127_v4 }
 0x170   : > { %2130 = vlog2.f32 %v796_v2  ;;  %v800_v29 = vadd.f32 1.0, %v799_v57  ;;  %vm803_vm15 = vcmp.lt.f32.partialorder %v802_v47, 0.0004427343 }
 0x171   : > { %v2751_v48 = vmul.f32 100.0, %v2747_v41  ;;  %v795_v21 = vsel %vm794_vm14, %v792_v52, %v789_v55 }
 0x172   : > { %v801_v62 = vmul.f32 %v2125_v39, %v800_v29  ;;  %v899_v60 = vmul.f32 0.01, %v795_v21 }
 0x173   : > { %v710_v3 = vmin.f32 %v2751_v48, 20.0  ;;  %vm918_vm6 = vcmp.gt.f32.partialorder %v2751_v48, 20.0 }
 0x174   : > { %v931_v19 = vsel %vm915_vm0, %v2721_v43, %v899_v60 }
 0x175   : > { %v2129_v49 = vpop.eup %2128  ;;  %v733_v56 = vmul.f32 1.442695, %v710_v3 }
 0x176   : > { %v2131_v45 = vpop.eup %2130  ;;  %v667_v26 = vpop.f32.mrf.mxu1  ;;  %v805_v32 = vadd.f32 1.0, %v2129_v49  ;;  %v808_v59 = vmul.f32 -0.5, %v2129_v49  ;;  %v811_v34 = vand.u32 2147483647, %v2129_v49 }
 0x177   : > { %2132 = vpow2.f32 %v733_v56  ;;  %v2755_v12 = vadd.f32 %v2696_v6, %v667_v26  ;;  %v798_v22 = vmul.f32 0.6931472, %v2131_v45 }
 0x178   : > { %2134 = vlog2.f32 %v805_v32  ;;  %v809_v36 = vadd.f32 1.0, %v808_v59  ;;  %vm812_vm2 = vcmp.lt.f32.partialorder %v811_v34, 0.0004427343 }
 0x179   : > { %v2758_v54 = vmul.f32 100.0, %v2755_v12  ;;  %v804_v63 = vsel %vm803_vm15, %v801_v62, %v798_v22 }
 0x17a   : > { %v900_v0 = vmul.f32 0.01, %v804_v63  ;;  %v810_v16 = vmul.f32 %v2129_v49, %v809_v36 }
 0x17b   : > { %v711_v51 = vmin.f32 %v2758_v54, 20.0  ;;  %vm919_vm9 = vcmp.gt.f32.partialorder %v2758_v54, 20.0 }
 0x17c   : > { %v932_v13 = vsel %vm916_vm1, %v2729_v35, %v900_v0 }
 0x17d   : > { %v2133_v5 = vpop.eup %2132  ;;  %v735_v42 = vmul.f32 1.442695, %v711_v51  ;;  %v945_v31 = vpack.c.bf16 %v932_v13, %v931_v19 }
 0x17e   : > { %v2135_v15 = vpop.eup %2134  ;;  %v669_v9 = vpop.f32.mrf.mxu1  ;;  %v814_v33 = vadd.f32 1.0, %v2133_v5  ;;  %v817_v11 = vmul.f32 -0.5, %v2133_v5  ;;  %v820_v8 = vand.u32 2147483647, %v2133_v5 }
 0x17f   : > { %2136 = vpow2.f32 %v735_v42  ;;  %v2766_v50 = vadd.f32 %v2696_v6, %v669_v9  ;;  %1965 = vmatmul.msk.bf16.gmra.mxu2 %vm613_vm5, %v945_v31  ;;  %v807_v35 = vmul.f32 0.6931472, %v2135_v15 }
 0x180   : > { %2138 = vlog2.f32 %v814_v33  ;;  %v818_v38 = vadd.f32 1.0, %v817_v11  ;;  %vm821_vm3 = vcmp.lt.f32.partialorder %v820_v8, 0.0004427343 }
 0x181   : > { %v2770_v43 = vmul.f32 100.0, %v2766_v50  ;;  %v813_v18 = vsel %vm812_vm2, %v810_v16, %v807_v35 }
 0x182   : > { %v819_v7 = vmul.f32 %v2133_v5, %v818_v38  ;;  %v901_v58 = vmul.f32 0.01, %v813_v18 }
 0x183   : > { %v712_v25 = vmin.f32 %v2770_v43, 20.0  ;;  %vm920_vm10 = vcmp.gt.f32.partialorder %v2770_v43, 20.0 }
 0x184   : > { %v933_v4 = vsel %vm917_vm4, %v2736_v20, %v901_v58 }
 0x185   : > { %v2137_v44 = vpop.eup %2136  ;;  %v737_v40 = vmul.f32 1.442695, %v712_v25 }
 0x186   : > { %v2139_v23 = vpop.eup %2138  ;;  %v672_v53 = vpop.f32.mrf.mxu1  ;;  %v823_v24 = vadd.f32 1.0, %v2137_v44  ;;  %v826_v30 = vmul.f32 -0.5, %v2137_v44  ;;  %v829_v29 = vand.u32 2147483647, %v2137_v44 }
 0x187   : > { %2140 = vpow2.f32 %v737_v40  ;;  %v2774_v1 = vadd.f32 %v2696_v6, %v672_v53  ;;  %v816_v28 = vmul.f32 0.6931472, %v2139_v23 }
 0x188   : > { %2142 = vlog2.f32 %v823_v24  ;;  %v827_v27 = vadd.f32 1.0, %v826_v30  ;;  %vm830_vm7 = vcmp.lt.f32.partialorder %v829_v29, 0.0004427343 }
 0x189   : > { %v2777_v14 = vmul.f32 100.0, %v2774_v1  ;;  %v822_v37 = vsel %vm821_vm3, %v819_v7, %v816_v28 }
 0x18a   : > { %v902_v39 = vmul.f32 0.01, %v822_v37  ;;  %v828_v49 = vmul.f32 %v2137_v44, %v827_v27 }
 0x18b   : > { %v713_v61 = vmin.f32 %v2777_v14, 20.0  ;;  %vm921_vm13 = vcmp.gt.f32.partialorder %v2777_v14, 20.0 }
 0x18c   : > { %v934_v10 = vsel %vm918_vm6, %v2747_v41, %v902_v39 }
 0x18d   : > { %v2141_v2 = vpop.eup %2140  ;;  %v739_v17 = vmul.f32 1.442695, %v713_v61  ;;  %v946_v57 = vpack.c.bf16 %v934_v10, %v933_v4 }
 0x18e   : > { %v2143_v46 = vpop.eup %2142  ;;  %v674_v55 = vpop.f32.mrf.mxu1  ;;  %v832_v3 = vadd.f32 1.0, %v2141_v2  ;;  %v835_v48 = vmul.f32 -0.5, %v2141_v2  ;;  %v838_v21 = vand.u32 2147483647, %v2141_v2 }
 0x18f   : > { %2144 = vpow2.f32 %v739_v17  ;;  %v2785_v52 = vadd.f32 %v2696_v6, %v674_v55  ;;  %1966 = vmatmul.msk.bf16.gmra.mxu2 %vm613_vm5, %v946_v57  ;;  %v825_v41 = vmul.f32 0.6931472, %v2143_v46 }
 0x190   : > { %2146 = vlog2.f32 %v832_v3  ;;  %v836_v56 = vadd.f32 1.0, %v835_v48  ;;  %vm839_vm8 = vcmp.lt.f32.partialorder %v838_v21, 0.0004427343 }
 0x191   : > { %v2789_v20 = vmul.f32 100.0, %v2785_v52  ;;  %v831_v32 = vsel %vm830_vm7, %v828_v49, %v825_v41 }
 0x192   : > { %v837_v51 = vmul.f32 %v2141_v2, %v836_v56  ;;  %v903_v59 = vmul.f32 0.01, %v831_v32 }
 0x193   : > { %v714_v47 = vmin.f32 %v2789_v20, 20.0  ;;  %vm922_vm14 = vcmp.gt.f32.partialorder %v2789_v20, 20.0 }
 0x194   : > { %v935_v15 = vsel %vm919_vm9, %v2755_v12, %v903_v59 }
 0x195   : > { %v2145_v45 = vpop.eup %2144  ;;  %v741_v26 = vmul.f32 1.442695, %v714_v47 }
 0x196   : > { %v2147_v22 = vpop.eup %2146  ;;  %v677_v62 = vpop.f32.mrf.mxu1  ;;  %v841_v60 = vadd.f32 1.0, %v2145_v45  ;;  %v844_v31 = vmul.f32 -0.5, %v2145_v45  ;;  %v847_v38 = vand.u32 2147483647, %v2145_v45 }
 0x197   : > { %2148 = vpow2.f32 %v741_v26  ;;  %v2793_v63 = vadd.f32 %v2696_v6, %v677_v62  ;;  %v834_v0 = vmul.f32 0.6931472, %v2147_v22 }
 0x198   : > { %2150 = vlog2.f32 %v841_v60  ;;  %v845_v54 = vadd.f32 1.0, %v844_v31  ;;  %vm848_vm11 = vcmp.lt.f32.partialorder %v847_v38, 0.0004427343 }
 0x199   : > { %v2796_v19 = vmul.f32 100.0, %v2793_v63  ;;  %v840_v13 = vsel %vm839_vm8, %v837_v51, %v834_v0 }
 0x19a   : > { %v904_v5 = vmul.f32 0.01, %v840_v13  ;;  %v846_v44 = vmul.f32 %v2145_v45, %v845_v54 }
 0x19b   : > { %v715_v42 = vmin.f32 %v2796_v19, 20.0  ;;  %vm923_vm1 = vcmp.gt.f32.partialorder %v2796_v19, 20.0 }
 0x19c   : > { %v936_v9 = vsel %vm920_vm10, %v2766_v50, %v904_v5 }
 0x19d   : > { %v2149_v33 = vpop.eup %2148  ;;  %v743_v36 = vmul.f32 1.442695, %v715_v42  ;;  %v947_v11 = vpack.c.bf16 %v936_v9, %v935_v15 }
 0x19e   : > { %v2151_v34 = vpop.eup %2150  ;;  %v679_v35 = vpop.f32.mrf.mxu1  ;;  %v850_v25 = vadd.f32 1.0, %v2149_v33  ;;  %v853_v43 = vmul.f32 -0.5, %v2149_v33  ;;  %v856_v18 = vand.u32 2147483647, %v2149_v33 }
 0x19f   : > { %2152 = vpow2.f32 %v743_v36  ;;  %v2804_v16 = vadd.f32 %v2696_v6, %v679_v35  ;;  %1967 = vmatmul.msk.bf16.gmra.mxu2 %vm613_vm5, %v947_v11  ;;  %v843_v50 = vmul.f32 0.6931472, %v2151_v34 }
 0x1a0   : > { %2154 = vlog2.f32 %v850_v25  ;;  %v854_v40 = vadd.f32 1.0, %v853_v43  ;;  %vm857_vm12 = vcmp.lt.f32.partialorder %v856_v18, 0.0004427343 }
 0x1a1   : > { %v2808_v12 = vmul.f32 100.0, %v2804_v16  ;;  %v849_v24 = vsel %vm848_vm11, %v846_v44, %v843_v50 }
 0x1a2   : > { %v855_v61 = vmul.f32 %v2149_v33, %v854_v40  ;;  %v905_v30 = vmul.f32 0.01, %v849_v24 }
 0x1a3   : > { %v716_v8 = vmin.f32 %v2808_v12, 20.0  ;;  %vm924_vm2 = vcmp.gt.f32.partialorder %v2808_v12, 20.0 }
 0x1a4   : > { %v937_v46 = vsel %vm921_vm13, %v2774_v1, %v905_v30 }
 0x1a5   : > { %v2153_v23 = vpop.eup %2152  ;;  %v745_v53 = vmul.f32 1.442695, %v716_v8 }
 0x1a6   : > { %v2155_v28 = vpop.eup %2154  ;;  %v682_v7 = vpop.f32.mrf.mxu1  ;;  %v859_v58 = vadd.f32 1.0, %v2153_v23  ;;  %v862_v57 = vmul.f32 -0.5, %v2153_v23  ;;  %v865_v56 = vand.u32 2147483647, %v2153_v23 }
 0x1a7   : > { %2156 = vpow2.f32 %v745_v53  ;;  %v2812_v37 = vadd.f32 %v2696_v6, %v682_v7  ;;  %v852_v39 = vmul.f32 0.6931472, %v2155_v28  ;;  %v985_v28 = vpop.permute.xlu0 %984  ;;  %v2835_v7 = vld [vmem:[%s3166_s3 + $0x2] ss:$0 sm:$0xff] }
 0x1a8   : > { %2158 = vlog2.f32 %v859_v58  ;;  %v863_v14 = vadd.f32 1.0, %v862_v57  ;;  %vm866_vm15 = vcmp.lt.f32.partialorder %v865_v56, 0.0004427343 }
 0x1a9   : > { %v2815_v4 = vmul.f32 100.0, %v2812_v37  ;;  %v858_v10 = vsel %vm857_vm12, %v855_v61, %v852_v39 }
 0x1aa   : > { %v906_v2 = vmul.f32 0.01, %v858_v10  ;;  %v864_v26 = vmul.f32 %v2153_v23, %v863_v14 }
 0x1ab   : > { %v717_v17 = vmin.f32 %v2815_v4, 20.0  ;;  %vm925_vm6 = vcmp.gt.f32.partialorder %v2815_v4, 20.0 }
 0x1ac   : > { %v938_v55 = vsel %vm922_vm14, %v2785_v52, %v906_v2  ;;  %v2021_v2 = vld [vmem:[%s3165_s2 + $0x28] sm:$0xff] }
 0x1ad   : > { %v2157_v3 = vpop.eup %2156  ;;  %v747_v27 = vmul.f32 1.442695, %v717_v17  ;;  %v948_v48 = vpack.c.bf16 %v938_v55, %v937_v46  ;;  %1442 = vmatpush.bf16.msrb.mxu3 %v2021_v2  ;;  %v2020_v46 = vld [vmem:[%s3165_s2 + $0x20] sm:$0xff] }
 0x1ae   : > { %v2159_v29 = vpop.eup %2158  ;;  %v684_v41 = vpop.f32.mrf.mxu1  ;;  %v868_v47 = vadd.f32 1.0, %v2157_v3  ;;  %v871_v20 = vmul.f32 -0.5, %v2157_v3  ;;  %v874_v32 = vand.u32 2147483647, %v2157_v3 }
 0x1af   : > { %2160 = vpow2.f32 %v747_v27  ;;  %v685_v49 = vadd.f32 %v2696_v6, %v684_v41  ;;  %1968 = vmatmul.msk.bf16.gmra.mxu2 %vm613_vm5, %v948_v48  ;;  %v861_v45 = vmul.f32 0.6931472, %v2159_v29  ;;  %v987_v4 = vpop.permute.xlu0 %986  ;;  %v989_v48 = vpop.permute.xlu1 %988 }
 0x1b0   : > { %2162 = vlog2.f32 %v868_v47  ;;  %v872_v52 = vadd.f32 1.0, %v871_v20  ;;  %vm875_vm0 = vcmp.lt.f32.partialorder %v874_v32, 0.0004427343 }
 0x1b1   : > { %v702_v21 = vmul.f32 100.0, %v685_v49  ;;  %v867_v60 = vsel %vm866_vm15, %v864_v26, %v861_v45  ;;  %1443 = vmatpush.bf16.msrb.mxu3 %v2020_v46 }
 0x1b2   : > { %v873_v59 = vmul.f32 %v2157_v3, %v872_v52  ;;  %v907_v13 = vmul.f32 0.01, %v867_v60 }
 0x1b3   : > { %v718_v1 = vmin.f32 %v702_v21, 20.0  ;;  %vm926_vm7 = vcmp.gt.f32.partialorder %v702_v21, 20.0 }
 0x1b4   : > { %v939_v15 = vsel %vm923_vm1, %v2793_v63, %v907_v13 }
 0x1b5   : > { %v2161_v22 = vpop.eup %2160  ;;  %v749_v62 = vmul.f32 1.442695, %v718_v1 }
 0x1b6   : > { %v2163_v0 = vpop.eup %2162  ;;  %v877_v51 = vadd.f32 1.0, %v2161_v22  ;;  %v880_v31 = vmul.f32 -0.5, %v2161_v22  ;;  %v883_v54 = vand.u32 2147483647, %v2161_v22 }
 0x1b7   : > { %2164 = vpow2.f32 %v749_v62  ;;  %v870_v6 = vmul.f32 0.6931472, %v2163_v0  ;;  %v991_v32 = vpop.permute.xlu1 %990 }
 0x1b8   : > { %2166 = vlog2.f32 %v877_v51  ;;  %v881_v35 = vadd.f32 1.0, %v880_v31  ;;  %vm884_vm3 = vcmp.lt.f32.partialorder %v883_v54, 0.0004427343 }
 0x1b9   : > { %v876_v5 = vsel %vm875_vm0, %v873_v59, %v870_v6 }
 0x1ba   : > { %v908_v42 = vmul.f32 0.01, %v876_v5  ;;  %v882_v38 = vmul.f32 %v2161_v22, %v881_v35  ;;  %v993_v5 = vpop.permute.xlu2 %992 }
 0x1bc   : > { %v940_v9 = vsel %vm924_vm2, %v2804_v16, %v908_v42 }
 0x1bd   : > { %v2165_v33 = vpop.eup %2164  ;;  %v949_v36 = vpack.c.bf16 %v940_v9, %v939_v15 }
 0x1be   : > { %v2167_v11 = vpop.eup %2166  ;;  %v886_v34 = vadd.f32 1.0, %v2165_v33  ;;  %v889_v25 = vmul.f32 -0.5, %v2165_v33  ;;  %v892_v12 = vand.u32 2147483647, %v2165_v33 }
 0x1bf   : > { %1969 = vmatmul.msk.bf16.gmra.mxu2 %vm613_vm5, %v949_v36  ;;  %v879_v43 = vmul.f32 0.6931472, %v2167_v11 }
 0x1c0   : > { %2168 = vlog2.f32 %v886_v34  ;;  %v890_v19 = vadd.f32 1.0, %v889_v25  ;;  %vm893_vm4 = vcmp.lt.f32.partialorder %v892_v12, 0.0004427343 }
 0x1c1   : > { %v885_v50 = vsel %vm884_vm3, %v882_v38, %v879_v43 }
 0x1c2   : > { %v891_v44 = vmul.f32 %v2165_v33, %v890_v19  ;;  %v909_v16 = vmul.f32 0.01, %v885_v50 }
 0x1c4   : > { %v941_v23 = vsel %vm925_vm6, %v2812_v37, %v909_v16 }
 0x1c6   : > { %v2169_v8 = vpop.eup %2168 }
 0x1c7   : > { %v888_v63 = vmul.f32 0.6931472, %v2169_v8 }
 0x1c9   : > { %v894_v40 = vsel %vm893_vm4, %v891_v44, %v888_v63 }
 0x1ca   : > { %v910_v18 = vmul.f32 0.01, %v894_v40 }
 0x1cc   : > { %v942_v53 = vsel %vm926_vm7, %v685_v49, %v910_v18 }
 0x1cd   : > { %v950_v24 = vpack.c.bf16 %v942_v53, %v941_v23  ;;  %v995_v23 = vpop.permute.xlu2 %994 }
 0x1cf   : > { %1970 = vmatmul.msk.bf16.gmra.mxu2 %vm613_vm5, %v950_v24 }
 0x1e2   : > { %v1065_v58 = vpop.f32.mrf.mxu2 }
 0x1e3   : > { %v1066_v39 = vadd.f32 %v1065_v58, %v985_v28 }
 0x1e5   : > { %v2838_v61 = vadd.f32 %v2835_v7, %v1066_v39 }
 0x1e7   : > { %v2841_v30 = vmul.f32 100.0, %v2838_v61 }
 0x1e9   : > { %v1142_v37 = vmin.f32 %v2841_v30, 20.0  ;;  %vm1350_vm10 = vcmp.gt.f32.partialorder %v2841_v30, 20.0 }
 0x1ea   : > { %v1067_v10 = vpop.f32.mrf.mxu2 }
 0x1eb   : > { %v1158_v17 = vmul.f32 1.442695, %v1142_v37  ;;  %v1068_v57 = vadd.f32 %v1067_v10, %v987_v4 }
 0x1ed   : > { %2170 = vpow2.f32 %v1158_v17  ;;  %v1111_v55 = vadd.f32 %v2835_v7, %v1068_v57 }
 0x1ef   : > { %v1127_v3 = vmul.f32 100.0, %v1111_v55 }
 0x1f1   : > { %v1143_v27 = vmin.f32 %v1127_v3, 20.0  ;;  %vm1351_vm11 = vcmp.gt.f32.partialorder %v1127_v3, 20.0  ;;  %v997_v3 = vpop.permute.xlu0 %996 }
 0x1f2   : > { %v1070_v47 = vpop.f32.mrf.mxu2 }
 0x1f3   : > { %v2171_v29 = vpop.eup %2170  ;;  %v1160_v41 = vmul.f32 1.442695, %v1143_v27  ;;  %v1071_v14 = vadd.f32 %v1070_v47, %v989_v48 }
 0x1f4   : > { %v1190_v49 = vadd.f32 1.0, %v2171_v29  ;;  %v1193_v21 = vmul.f32 -0.5, %v2171_v29  ;;  %v1196_v6 = vand.u32 2147483647, %v2171_v29 }
 0x1f5   : > { %2172 = vpow2.f32 %v1160_v41  ;;  %v2852_v20 = vadd.f32 %v2835_v7, %v1071_v14 }
 0x1f6   : > { %2174 = vlog2.f32 %v1190_v49  ;;  %v1194_v60 = vadd.f32 1.0, %v1193_v21  ;;  %vm1197_vm8 = vcmp.lt.f32.partialorder %v1196_v6, 0.0004427343 }
 0x1f7   : > { %v2855_v56 = vmul.f32 100.0, %v2852_v20 }
 0x1f8   : > { %v1195_v42 = vmul.f32 %v2171_v29, %v1194_v60 }
 0x1f9   : > { %v1144_v45 = vmin.f32 %v2855_v56, 20.0  ;;  %vm1352_vm14 = vcmp.gt.f32.partialorder %v2855_v56, 20.0 }
 0x1fa   : > { %v1072_v26 = vpop.f32.mrf.mxu2 }
 0x1fb   : > { %v2173_v1 = vpop.eup %2172  ;;  %v1162_v62 = vmul.f32 1.442695, %v1144_v45  ;;  %v1073_v51 = vadd.f32 %v1072_v26, %v991_v32 }
 0x1fc   : > { %v2175_v52 = vpop.eup %2174  ;;  %v1199_v22 = vadd.f32 1.0, %v2173_v1  ;;  %v1202_v0 = vmul.f32 -0.5, %v2173_v1  ;;  %v1205_v9 = vand.u32 2147483647, %v2173_v1 }
 0x1fd   : > { %v1192_v59 = vmul.f32 0.6931472, %v2175_v52  ;;  %v2859_v13 = vadd.f32 %v2835_v7, %v1073_v51 }
 0x1fe   : > { %2176 = vlog2.f32 %v1199_v22  ;;  %v1203_v31 = vadd.f32 1.0, %v1202_v0  ;;  %vm1206_vm9 = vcmp.lt.f32.partialorder %v1205_v9, 0.0004427343 }
 0x1ff   : > { %2178 = vpow2.f32 %v1162_v62  ;;  %v2862_v15 = vmul.f32 100.0, %v2859_v13  ;;  %v1198_v33 = vsel %vm1197_vm8, %v1195_v42, %v1192_v59  ;;  %v999_v59 = vpop.permute.xlu1 %998 }
 0x200   : > { %v1204_v43 = vmul.f32 %v2173_v1, %v1203_v31  ;;  %v1334_v19 = vmul.f32 0.01, %v1198_v33 }
 0x201   : > { %v1145_v36 = vmin.f32 %v2862_v15, 20.0  ;;  %vm1353_vm15 = vcmp.gt.f32.partialorder %v2862_v15, 20.0 }
 0x202   : > { %v1075_v11 = vpop.f32.mrf.mxu2  ;;  %v1366_v16 = vsel %vm1350_vm10, %v2838_v61, %v1334_v19 }
 0x203   : > { %v1076_v35 = vadd.f32 %v1075_v11, %v993_v5  ;;  %v1164_v38 = vmul.f32 1.442695, %v1145_v36 }
 0x204   : > { %v2177_v34 = vpop.eup %2176 }
 0x205   : > { %v2179_v25 = vpop.eup %2178  ;;  %v1201_v54 = vmul.f32 0.6931472, %v2177_v34  ;;  %v2866_v12 = vadd.f32 %v2835_v7, %v1076_v35  ;;  %2180 = vpow2.f32 %v1164_v38 }
 0x206   : > { %v1208_v50 = vadd.f32 1.0, %v2179_v25  ;;  %v1211_v28 = vmul.f32 -0.5, %v2179_v25  ;;  %v1214_v57 = vand.u32 2147483647, %v2179_v25 }
 0x207   : > { %v1207_v8 = vsel %vm1206_vm9, %v1204_v43, %v1201_v54  ;;  %v2869_v44 = vmul.f32 100.0, %v2866_v12 }
 0x208   : > { %v1335_v63 = vmul.f32 0.01, %v1207_v8  ;;  %2182 = vlog2.f32 %v1208_v50  ;;  %v1212_v2 = vadd.f32 1.0, %v1211_v28  ;;  %vm1215_vm12 = vcmp.lt.f32.partialorder %v1214_v57, 0.0004427343  ;;  %v1001_v50 = vpop.permute.xlu2 %1000 }
 0x209   : > { %v1146_v18 = vmin.f32 %v2869_v44, 20.0  ;;  %vm1354_vm2 = vcmp.gt.f32.partialorder %v2869_v44, 20.0 }
 0x20a   : > { %v1367_v40 = vsel %vm1351_vm11, %v1111_v55, %v1335_v63  ;;  %v1077_v53 = vpop.f32.mrf.mxu2  ;;  %v1213_v48 = vmul.f32 %v2179_v25, %v1212_v2 }
 0x20b   : > { %v1382_v24 = vpack.c.bf16 %v1367_v40, %v1366_v16  ;;  %v1166_v58 = vmul.f32 1.442695, %v1146_v18  ;;  %v1078_v39 = vadd.f32 %v1077_v53, %v995_v23  ;;  %v2181_v37 = vpop.eup %2180 }
 0x20c   : > { %v1217_v30 = vadd.f32 1.0, %v2181_v37  ;;  %v1220_v61 = vmul.f32 -0.5, %v2181_v37  ;;  %v1223_v14 = vand.u32 2147483647, %v2181_v37 }
 0x20d   : > { %1985 = vmatmul.msk.bf16.vlgmr.msrb.gmra.mxu3 %vm613_vm5, %v1382_v24  ;;  %2184 = vpow2.f32 %v1166_v58  ;;  %v2876_v10 = vadd.f32 %v2835_v7, %v1078_v39 }
 0x20e   : > { %v2183_v4 = vpop.eup %2182  ;;  %2186 = vlog2.f32 %v1217_v30  ;;  %v1221_v29 = vadd.f32 1.0, %v1220_v61  ;;  %vm1224_vm13 = vcmp.lt.f32.partialorder %v1223_v14, 0.0004427343 }
 0x20f   : > { %v2879_v17 = vmul.f32 100.0, %v2876_v10  ;;  %v1210_v46 = vmul.f32 0.6931472, %v2183_v4 }
 0x210   : > { %v1222_v32 = vmul.f32 %v2181_v37, %v1221_v29 }
 0x211   : > { %v1147_v55 = vmin.f32 %v2879_v17, 20.0  ;;  %v1216_v21 = vsel %vm1215_vm12, %v1213_v48, %v1210_v46  ;;  %vm1355_vm3 = vcmp.gt.f32.partialorder %v2879_v17, 20.0  ;;  %v1003_v46 = vpop.permute.xlu0 %1002 }
 0x212   : > { %v1080_v27 = vpop.f32.mrf.mxu2  ;;  %v1336_v62 = vmul.f32 0.01, %v1216_v21 }
 0x213   : > { %v2185_v41 = vpop.eup %2184  ;;  %v1168_v47 = vmul.f32 1.442695, %v1147_v55  ;;  %v1081_v49 = vadd.f32 %v1080_v27, %v997_v3 }
 0x214   : > { %v1226_v45 = vadd.f32 1.0, %v2185_v41  ;;  %v2187_v1 = vpop.eup %2186  ;;  %v1229_v6 = vmul.f32 -0.5, %v2185_v41  ;;  %v1368_v33 = vsel %vm1352_vm14, %v2852_v20, %v1336_v62  ;;  %v1232_v56 = vand.u32 2147483647, %v2185_v41  ;;  %v1005_v62 = vpop.permute.xlu1 %1004 }
 0x215   : > { %2188 = vpow2.f32 %v1168_v47  ;;  %v2883_v26 = vadd.f32 %v2835_v7, %v1081_v49  ;;  %v1219_v52 = vmul.f32 0.6931472, %v2187_v1 }
 0x216   : > { %2190 = vlog2.f32 %v1226_v45  ;;  %v1230_v54 = vadd.f32 1.0, %v1229_v6  ;;  %vm1233_vm0 = vcmp.lt.f32.partialorder %v1232_v56, 0.0004427343 }
 0x217   : > { %v2886_v22 = vmul.f32 100.0, %v2883_v26  ;;  %v1225_v60 = vsel %vm1224_vm13, %v1222_v32, %v1219_v52 }
 0x218   : > { %v1337_v51 = vmul.f32 0.01, %v1225_v60 }
 0x219   : > { %v1148_v0 = vmin.f32 %v2886_v22, 20.0  ;;  %vm1356_vm7 = vcmp.gt.f32.partialorder %v2886_v22, 20.0 }
 0x21a   : > { %v1082_v5 = vpop.f32.mrf.mxu2  ;;  %v1369_v36 = vsel %vm1353_vm15, %v2859_v13, %v1337_v51  ;;  %v1231_v13 = vmul.f32 %v2185_v41, %v1230_v54 }
 0x21b   : > { %v2189_v42 = vpop.eup %2188  ;;  %v1170_v31 = vmul.f32 1.442695, %v1148_v0  ;;  %v1083_v9 = vadd.f32 %v1082_v5, %v999_v59  ;;  %v1383_v34 = vpack.c.bf16 %v1369_v36, %v1368_v33 }
 0x21c   : > { %v2191_v11 = vpop.eup %2190  ;;  %v1235_v35 = vadd.f32 1.0, %v2189_v42  ;;  %v1238_v43 = vmul.f32 -0.5, %v2189_v42  ;;  %v1241_v63 = vand.u32 2147483647, %v2189_v42 }
 0x21d   : > { %2192 = vpow2.f32 %v1170_v31  ;;  %v2894_v25 = vadd.f32 %v2835_v7, %v1083_v9  ;;  %1986 = vmatmul.msk.bf16.gmra.mxu3 %vm613_vm5, %v1383_v34  ;;  %v1228_v38 = vmul.f32 0.6931472, %v2191_v11 }
 0x21e   : > { %2194 = vlog2.f32 %v1235_v35  ;;  %v1239_v19 = vadd.f32 1.0, %v1238_v43  ;;  %vm1242_vm1 = vcmp.lt.f32.partialorder %v1241_v63, 0.0004427343 }
 0x21f   : > { %v2898_v15 = vmul.f32 100.0, %v2894_v25  ;;  %v1234_v23 = vsel %vm1233_vm0, %v1231_v13, %v1228_v38  ;;  %v1007_v38 = vpop.permute.xlu2 %1006 }
 0x220   : > { %v1240_v39 = vmul.f32 %v2189_v42, %v1239_v19  ;;  %v1338_v37 = vmul.f32 0.01, %v1234_v23 }
 0x221   : > { %v1149_v20 = vmin.f32 %v2898_v15, 20.0  ;;  %vm1357_vm8 = vcmp.gt.f32.partialorder %v2898_v15, 20.0 }
 0x222   : > { %v1085_v8 = vpop.f32.mrf.mxu2  ;;  %v1370_v3 = vsel %vm1354_vm2, %v2866_v12, %v1338_v37  ;;  %v1009_v37 = vpop.permute.xlu0 %1008 }
 0x223   : > { %v2193_v16 = vpop.eup %2192  ;;  %v1172_v40 = vmul.f32 1.442695, %v1149_v20  ;;  %v1086_v18 = vadd.f32 %v1085_v8, %v1001_v50 }
 0x224   : > { %v2195_v53 = vpop.eup %2194  ;;  %v1244_v24 = vadd.f32 1.0, %v2193_v16  ;;  %v1247_v57 = vmul.f32 -0.5, %v2193_v16  ;;  %v1250_v45 = vand.u32 2147483647, %v2193_v16 }
 0x225   : > { %2196 = vpow2.f32 %v1172_v40  ;;  %v2902_v28 = vadd.f32 %v2835_v7, %v1086_v18  ;;  %v1237_v58 = vmul.f32 0.6931472, %v2195_v53 }
 0x226   : > { %2198 = vlog2.f32 %v1244_v24  ;;  %v1248_v17 = vadd.f32 1.0, %v1247_v57  ;;  %vm1251_vm4 = vcmp.lt.f32.partialorder %v1250_v45, 0.0004427343 }
 0x227   : > { %v2905_v4 = vmul.f32 100.0, %v2902_v28  ;;  %v1243_v30 = vsel %vm1242_vm1, %v1240_v39, %v1237_v58 }
 0x228   : > { %v1339_v2 = vmul.f32 0.01, %v1243_v30  ;;  %v1249_v52 = vmul.f32 %v2193_v16, %v1248_v17 }
 0x229   : > { %v1150_v61 = vmin.f32 %v2905_v4, 20.0  ;;  %vm1358_vm11 = vcmp.gt.f32.partialorder %v2905_v4, 20.0 }
 0x22a   : > { %v1087_v55 = vpop.f32.mrf.mxu2  ;;  %v1371_v27 = vsel %vm1355_vm3, %v2876_v10, %v1339_v2 }
 0x22b   : > { %v2197_v48 = vpop.eup %2196  ;;  %v1174_v29 = vmul.f32 1.442695, %v1150_v61  ;;  %v1088_v41 = vadd.f32 %v1087_v55, %v1003_v46  ;;  %v1384_v47 = vpack.c.bf16 %v1371_v27, %v1370_v3 }
 0x22c   : > { %v2199_v49 = vpop.eup %2198  ;;  %v1253_v14 = vadd.f32 1.0, %v2197_v48  ;;  %v1256_v21 = vmul.f32 -0.5, %v2197_v48  ;;  %v1259_v0 = vand.u32 2147483647, %v2197_v48 }
 0x22d   : > { %2200 = vpow2.f32 %v1174_v29  ;;  %v2913_v44 = vadd.f32 %v2835_v7, %v1088_v41  ;;  %1987 = vmatmul.msk.bf16.gmra.mxu3 %vm613_vm5, %v1384_v47  ;;  %v1246_v10 = vmul.f32 0.6931472, %v2199_v49 }
 0x22e   : > { %2202 = vlog2.f32 %v1253_v14  ;;  %v1257_v32 = vadd.f32 1.0, %v1256_v21  ;;  %vm1260_vm6 = vcmp.lt.f32.partialorder %v1259_v0, 0.0004427343 }
 0x22f   : > { %v2917_v12 = vmul.f32 100.0, %v2913_v44  ;;  %v1252_v5 = vsel %vm1251_vm4, %v1249_v52, %v1246_v10  ;;  %v1011_v10 = vpop.permute.xlu1 %1010 }
 0x230   : > { %v1258_v36 = vmul.f32 %v2197_v48, %v1257_v32  ;;  %v1340_v11 = vmul.f32 0.01, %v1252_v5 }
 0x231   : > { %v1151_v1 = vmin.f32 %v2917_v12, 20.0  ;;  %vm1359_vm12 = vcmp.gt.f32.partialorder %v2917_v12, 20.0 }
 0x232   : > { %v1090_v60 = vpop.f32.mrf.mxu2  ;;  %v1372_v13 = vsel %vm1356_vm7, %v2883_v26, %v1340_v11  ;;  %v1013_v11 = vpop.permute.xlu2 %1012 }
 0x233   : > { %v2201_v51 = vpop.eup %2200  ;;  %v1176_v6 = vmul.f32 1.442695, %v1151_v1  ;;  %v1091_v59 = vadd.f32 %v1090_v60, %v1005_v62 }
 0x234   : > { %v2203_v42 = vpop.eup %2202  ;;  %v1262_v31 = vadd.f32 1.0, %v2201_v51  ;;  %v1265_v56 = vmul.f32 -0.5, %v2201_v51  ;;  %v1268_v53 = vand.u32 2147483647, %v2201_v51 }
 0x235   : > { %2204 = vpow2.f32 %v1176_v6  ;;  %v2921_v9 = vadd.f32 %v2835_v7, %v1091_v59  ;;  %v1255_v33 = vmul.f32 0.6931472, %v2203_v42 }
 0x236   : > { %2206 = vlog2.f32 %v1262_v31  ;;  %v1266_v15 = vadd.f32 1.0, %v1265_v56  ;;  %vm1269_vm9 = vcmp.lt.f32.partialorder %v1268_v53, 0.0004427343 }
 0x237   : > { %v2924_v34 = vmul.f32 100.0, %v2921_v9  ;;  %v1261_v35 = vsel %vm1260_vm6, %v1258_v36, %v1255_v33 }
 0x238   : > { %v1341_v54 = vmul.f32 0.01, %v1261_v35  ;;  %v1267_v58 = vmul.f32 %v2201_v51, %v1266_v15 }
 0x239   : > { %v1152_v43 = vmin.f32 %v2924_v34, 20.0  ;;  %vm1360_vm15 = vcmp.gt.f32.partialorder %v2924_v34, 20.0 }
 0x23a   : > { %v1092_v20 = vpop.f32.mrf.mxu2  ;;  %v1373_v19 = vsel %vm1357_vm8, %v2894_v25, %v1341_v54 }
 0x23b   : > { %v2205_v50 = vpop.eup %2204  ;;  %v1178_v8 = vmul.f32 1.442695, %v1152_v43  ;;  %v1093_v63 = vadd.f32 %v1092_v20, %v1007_v38  ;;  %v1385_v16 = vpack.c.bf16 %v1373_v19, %v1372_v13 }
 0x23c   : > { %v2207_v40 = vpop.eup %2206  ;;  %v1271_v18 = vadd.f32 1.0, %v2205_v50  ;;  %v1274_v23 = vmul.f32 -0.5, %v2205_v50  ;;  %v1277_v2 = vand.u32 2147483647, %v2205_v50 }
 0x23d   : > { %2208 = vpow2.f32 %v1178_v8  ;;  %v2932_v22 = vadd.f32 %v2835_v7, %v1093_v63  ;;  %1988 = vmatmul.msk.bf16.gmra.mxu3 %vm613_vm5, %v1385_v16  ;;  %v1264_v25 = vmul.f32 0.6931472, %v2207_v40 }
 0x23e   : > { %2210 = vlog2.f32 %v1271_v18  ;;  %v1275_v39 = vadd.f32 1.0, %v1274_v23  ;;  %vm1278_vm10 = vcmp.lt.f32.partialorder %v1277_v2, 0.0004427343 }
 0x23f   : > { %v2936_v26 = vmul.f32 100.0, %v2932_v22  ;;  %v1270_v55 = vsel %vm1269_vm9, %v1267_v58, %v1264_v25  ;;  %v1015_v25 = vpop.permute.xlu0 %1014 }
 0x240   : > { %v1276_v41 = vmul.f32 %v2205_v50, %v1275_v39  ;;  %v1342_v47 = vmul.f32 0.01, %v1270_v55 }
 0x241   : > { %v1153_v24 = vmin.f32 %v2936_v26, 20.0  ;;  %vm1361_vm0 = vcmp.gt.f32.partialorder %v2936_v26, 20.0 }
 0x242   : > { %v1095_v30 = vpop.f32.mrf.mxu2  ;;  %v1374_v52 = vsel %vm1358_vm11, %v2902_v28, %v1342_v47 }
 0x243   : > { %v2209_v61 = vpop.eup %2208  ;;  %v1180_v57 = vmul.f32 1.442695, %v1153_v24  ;;  %v1096_v46 = vadd.f32 %v1095_v30, %v1009_v37 }
 0x244   : > { %v2211_v3 = vpop.eup %2210  ;;  %v1280_v27 = vadd.f32 1.0, %v2209_v61  ;;  %v1283_v45 = vmul.f32 -0.5, %v2209_v61  ;;  %v1286_v42 = vand.u32 2147483647, %v2209_v61 }
 0x245   : > { %2212 = vpow2.f32 %v1180_v57  ;;  %v2940_v48 = vadd.f32 %v2835_v7, %v1096_v46  ;;  %v1273_v29 = vmul.f32 0.6931472, %v2211_v3 }
 0x246   : > { %2214 = vlog2.f32 %v1280_v27  ;;  %v1284_v12 = vadd.f32 1.0, %v1283_v45  ;;  %vm1287_vm13 = vcmp.lt.f32.partialorder %v1286_v42, 0.0004427343 }
 0x247   : > { %v2943_v49 = vmul.f32 100.0, %v2940_v48  ;;  %v1279_v14 = vsel %vm1278_vm10, %v1276_v41, %v1273_v29 }
 0x248   : > { %v1343_v17 = vmul.f32 0.01, %v1279_v14  ;;  %v1285_v33 = vmul.f32 %v2209_v61, %v1284_v12 }
 0x249   : > { %v1154_v21 = vmin.f32 %v2943_v49, 20.0  ;;  %vm1362_vm3 = vcmp.gt.f32.partialorder %v2943_v49, 20.0 }
 0x24a   : > { %v1097_v1 = vpop.f32.mrf.mxu2  ;;  %v1375_v32 = vsel %vm1359_vm12, %v2913_v44, %v1343_v17 }
 0x24b   : > { %v2213_v62 = vpop.eup %2212  ;;  %v1182_v60 = vmul.f32 1.442695, %v1154_v21  ;;  %v1098_v0 = vadd.f32 %v1097_v1, %v1011_v10  ;;  %v1386_v51 = vpack.c.bf16 %v1375_v32, %v1374_v52 }
 0x24c   : > { %v2215_v6 = vpop.eup %2214  ;;  %v1289_v59 = vadd.f32 1.0, %v2213_v62  ;;  %v1292_v5 = vmul.f32 -0.5, %v2213_v62  ;;  %v1295_v54 = vand.u32 2147483647, %v2213_v62 }
 0x24d   : > { %2216 = vpow2.f32 %v1182_v60  ;;  %v2951_v4 = vadd.f32 %v2835_v7, %v1098_v0  ;;  %1989 = vmatmul.msk.bf16.gmra.mxu3 %vm613_vm5, %v1386_v51  ;;  %v1282_v44 = vmul.f32 0.6931472, %v2215_v6 }
 0x24e   : > { %2218 = vlog2.f32 %v1289_v59  ;;  %v1293_v36 = vadd.f32 1.0, %v1292_v5  ;;  %vm1296_vm14 = vcmp.lt.f32.partialorder %v1295_v54, 0.0004427343 }
 0x24f   : > { %v2955_v28 = vmul.f32 100.0, %v2951_v4  ;;  %v1288_v20 = vsel %vm1287_vm13, %v1285_v33, %v1282_v44 }
 0x250   : > { %v1294_v63 = vmul.f32 %v2213_v62, %v1293_v36  ;;  %v1344_v16 = vmul.f32 0.01, %v1288_v20 }
 0x251   : > { %v1155_v31 = vmin.f32 %v2955_v28, 20.0  ;;  %vm1363_vm4 = vcmp.gt.f32.partialorder %v2955_v28, 20.0 }
 0x252   : > { %v1100_v35 = vpop.f32.mrf.mxu2  ;;  %v1376_v58 = vsel %vm1360_vm15, %v2921_v9, %v1344_v16 }
 0x253   : > { %v2217_v43 = vpop.eup %2216  ;;  %v1184_v56 = vmul.f32 1.442695, %v1155_v31  ;;  %v1101_v38 = vadd.f32 %v1100_v35, %v1013_v11 }
 0x254   : > { %v2219_v13 = vpop.eup %2218  ;;  %v1298_v19 = vadd.f32 1.0, %v2217_v43  ;;  %v1301_v53 = vmul.f32 -0.5, %v2217_v43  ;;  %v1304_v3 = vand.u32 2147483647, %v2217_v43 }
 0x255   : > { %2220 = vpow2.f32 %v1184_v56  ;;  %v2959_v50 = vadd.f32 %v2835_v7, %v1101_v38  ;;  %v1291_v8 = vmul.f32 0.6931472, %v2219_v13 }
 0x256   : > { %2222 = vlog2.f32 %v1298_v19  ;;  %v1302_v55 = vadd.f32 1.0, %v1301_v53  ;;  %vm1305_vm1 = vcmp.lt.f32.partialorder %v1304_v3, 0.0004427343  ;;  %v2982_v19 = vld [vmem:[%s3166_s3 + $0x3] ss:$0 sm:$0xff]  ;;  %v2022_v53 = vld [vmem:[%s3165_s2 + $0x30] sm:$0xff] }
 0x257   : > { %v2962_v40 = vmul.f32 100.0, %v2959_v50  ;;  %v1297_v18 = vsel %vm1296_vm14, %v1294_v63, %v1291_v8 }
 0x258   : > { %v1345_v15 = vmul.f32 0.01, %v1297_v18  ;;  %v1303_v41 = vmul.f32 %v2217_v43, %v1302_v55 }
 0x259   : > { %v1156_v23 = vmin.f32 %v2962_v40, 20.0  ;;  %vm1364_vm8 = vcmp.gt.f32.partialorder %v2962_v40, 20.0  ;;  %v2023_v40 = vld [vmem:[%s3165_s2 + $0x38] sm:$0xff] }
 0x25a   : > { %v1102_v24 = vpop.f32.mrf.mxu2  ;;  %v1377_v39 = vsel %vm1361_vm0, %v2932_v22, %v1345_v15  ;;  %1801 = vmatpush.bf16.msrb.mxu0 %v2023_v40 }
 0x25b   : > { %v2221_v37 = vpop.eup %2220  ;;  %v1186_v30 = vmul.f32 1.442695, %v1156_v23  ;;  %v1103_v2 = vadd.f32 %v1102_v24, %v1015_v25  ;;  %v1387_v61 = vpack.c.bf16 %v1377_v39, %v1376_v58 }
 0x25c   : > { %v2223_v57 = vpop.eup %2222  ;;  %v1307_v46 = vadd.f32 1.0, %v2221_v37  ;;  %v1310_v26 = vmul.f32 -0.5, %v2221_v37  ;;  %v1313_v47 = vand.u32 2147483647, %v2221_v37 }
 0x25d   : > { %2224 = vpow2.f32 %v1186_v30  ;;  %v1125_v34 = vadd.f32 %v2835_v7, %v1103_v2  ;;  %1990 = vmatmul.msk.bf16.gmra.mxu3 %vm613_vm5, %v1387_v61  ;;  %v1300_v29 = vmul.f32 0.6931472, %v2223_v57 }
 0x25e   : > { %2226 = vlog2.f32 %v1307_v46  ;;  %v1311_v22 = vadd.f32 1.0, %v1310_v26  ;;  %vm1314_vm2 = vcmp.lt.f32.partialorder %v1313_v47, 0.0004427343  ;;  %1802 = vmatpush.bf16.msrb.mxu0 %v2022_v53 }
 0x25f   : > { %v1141_v27 = vmul.f32 100.0, %v1125_v34  ;;  %v1306_v21 = vsel %vm1305_vm1, %v1303_v41, %v1300_v29 }
 0x260   : > { %v1312_v1 = vmul.f32 %v2221_v37, %v1311_v22  ;;  %v1346_v52 = vmul.f32 0.01, %v1306_v21 }
 0x261   : > { %v1157_v9 = vmin.f32 %v1141_v27, 20.0  ;;  %vm1365_vm9 = vcmp.gt.f32.partialorder %v1141_v27, 20.0 }
 0x262   : > { %v1378_v0 = vsel %vm1362_vm3, %v2940_v48, %v1346_v52 }
 0x263   : > { %v2225_v14 = vpop.eup %2224  ;;  %v1188_v17 = vmul.f32 1.442695, %v1157_v9 }
 0x264   : > { %v2227_v45 = vpop.eup %2226  ;;  %v1316_v10 = vadd.f32 1.0, %v2225_v14  ;;  %v1319_v60 = vmul.f32 -0.5, %v2225_v14  ;;  %v1322_v31 = vand.u32 2147483647, %v2225_v14 }
 0x265   : > { %2228 = vpow2.f32 %v1188_v17  ;;  %v1309_v7 = vmul.f32 0.6931472, %v2227_v45 }
 0x266   : > { %2230 = vlog2.f32 %v1316_v10  ;;  %v1320_v42 = vadd.f32 1.0, %v1319_v60  ;;  %vm1323_vm6 = vcmp.lt.f32.partialorder %v1322_v31, 0.0004427343 }
 0x267   : > { %v1315_v32 = vsel %vm1314_vm2, %v1312_v1, %v1309_v7 }
 0x268   : > { %v1347_v62 = vmul.f32 0.01, %v1315_v32  ;;  %v1321_v36 = vmul.f32 %v2225_v14, %v1320_v42 }
 0x26a   : > { %v1379_v51 = vsel %vm1363_vm4, %v2951_v4, %v1347_v62 }
 0x26b   : > { %v2229_v6 = vpop.eup %2228  ;;  %v1388_v59 = vpack.c.bf16 %v1379_v51, %v1378_v0 }
 0x26c   : > { %v2231_v12 = vpop.eup %2230  ;;  %v1325_v5 = vadd.f32 1.0, %v2229_v6  ;;  %v1328_v44 = vmul.f32 -0.5, %v2229_v6  ;;  %v1331_v28 = vand.u32 2147483647, %v2229_v6 }
 0x26d   : > { %1991 = vmatmul.msk.bf16.gmra.mxu3 %vm613_vm5, %v1388_v59  ;;  %v1318_v33 = vmul.f32 0.6931472, %v2231_v12 }
 0x26e   : > { %2232 = vlog2.f32 %v1325_v5  ;;  %v1329_v49 = vadd.f32 1.0, %v1328_v44  ;;  %vm1332_vm7 = vcmp.lt.f32.partialorder %v1331_v28, 0.0004427343 }
 0x26f   : > { %v1324_v11 = vsel %vm1323_vm6, %v1321_v36, %v1318_v33 }
 0x270   : > { %v1330_v54 = vmul.f32 %v2229_v6, %v1329_v49  ;;  %v1348_v4 = vmul.f32 0.01, %v1324_v11 }
 0x272   : > { %v1380_v38 = vsel %vm1364_vm8, %v2959_v50, %v1348_v4 }
 0x274   : > { %v2233_v35 = vpop.eup %2232 }
 0x275   : > { %v1327_v48 = vmul.f32 0.6931472, %v2233_v35 }
 0x277   : > { %v1333_v43 = vsel %vm1332_vm7, %v1330_v54, %v1327_v48 }
 0x278   : > { %v1349_v56 = vmul.f32 0.01, %v1333_v43 }
 0x27a   : > { %v1381_v20 = vsel %vm1365_vm9, %v1125_v34, %v1349_v56 }
 0x27b   : > { %v1389_v13 = vpack.c.bf16 %v1381_v20, %v1380_v38 }
 0x27d   : > { %1992 = vmatmul.msk.bf16.gmra.mxu3 %vm613_vm5, %v1389_v13 }
 0x290   : > { %v1445_v8 = vpop.f32.mrf.mxu3 }
 0x291   : > { %v1446_v63 = vadd.f32 %v2982_v19, %v1445_v8 }
 0x293   : > { %v1485_v16 = vmul.f32 100.0, %v1446_v63 }
 0x295   : > { %v1501_v18 = vmin.f32 %v1485_v16, 20.0  ;;  %vm1709_vm12 = vcmp.gt.f32.partialorder %v1485_v16, 20.0 }
 0x297   : > { %v1517_v15 = vmul.f32 1.442695, %v1501_v18 }
 0x298   : > { %v1447_v50 = vpop.f32.mrf.mxu3 }
 0x299   : > { %2234 = vpow2.f32 %v1517_v15  ;;  %v1448_v23 = vadd.f32 %v2982_v19, %v1447_v50 }
 0x29b   : > { %v1486_v25 = vmul.f32 100.0, %v1448_v23 }
 0x29d   : > { %v1502_v24 = vmin.f32 %v1486_v25, 20.0  ;;  %vm1710_vm13 = vcmp.gt.f32.partialorder %v1486_v25, 20.0 }
 0x29f   : > { %v2235_v58 = vpop.eup %2234  ;;  %v1519_v39 = vmul.f32 1.442695, %v1502_v24 }
 0x2a0   : > { %v1549_v37 = vadd.f32 1.0, %v2235_v58  ;;  %v1450_v30 = vpop.f32.mrf.mxu3  ;;  %v1552_v61 = vmul.f32 -0.5, %v2235_v58  ;;  %v1555_v9 = vand.u32 2147483647, %v2235_v58 }
 0x2a1   : > { %2236 = vpow2.f32 %v1519_v39  ;;  %v2993_v2 = vadd.f32 %v2982_v19, %v1450_v30 }
 0x2a2   : > { %2238 = vlog2.f32 %v1549_v37  ;;  %v1553_v3 = vadd.f32 1.0, %v1552_v61  ;;  %vm1556_vm10 = vcmp.lt.f32.partialorder %v1555_v9, 0.0004427343 }
 0x2a3   : > { %v2996_v57 = vmul.f32 100.0, %v2993_v2 }
 0x2a4   : > { %v1554_v14 = vmul.f32 %v2235_v58, %v1553_v3 }
 0x2a5   : > { %v1503_v34 = vmin.f32 %v2996_v57, 20.0  ;;  %vm1711_vm0 = vcmp.gt.f32.partialorder %v2996_v57, 20.0 }
 0x2a7   : > { %v2237_v46 = vpop.eup %2236  ;;  %v1521_v29 = vmul.f32 1.442695, %v1503_v34 }
 0x2a8   : > { %v2239_v55 = vpop.eup %2238  ;;  %v1558_v26 = vadd.f32 1.0, %v2237_v46  ;;  %v1561_v27 = vmul.f32 -0.5, %v2237_v46  ;;  %v1452_v41 = vpop.f32.mrf.mxu3  ;;  %v1564_v45 = vand.u32 2147483647, %v2237_v46 }
 0x2a9   : > { %v1551_v22 = vmul.f32 0.6931472, %v2239_v55  ;;  %v3000_v47 = vadd.f32 %v2982_v19, %v1452_v41 }
 0x2aa   : > { %2240 = vlog2.f32 %v1558_v26  ;;  %v1562_v17 = vadd.f32 1.0, %v1561_v27  ;;  %vm1565_vm11 = vcmp.lt.f32.partialorder %v1564_v45, 0.0004427343 }
 0x2ab   : > { %2242 = vpow2.f32 %v1521_v29  ;;  %v3003_v21 = vmul.f32 100.0, %v3000_v47  ;;  %v1557_v10 = vsel %vm1556_vm10, %v1554_v14, %v1551_v22 }
 0x2ac   : > { %v1563_v62 = vmul.f32 %v2237_v46, %v1562_v17  ;;  %v1693_v0 = vmul.f32 0.01, %v1557_v10 }
 0x2ad   : > { %v1504_v7 = vmin.f32 %v3003_v21, 20.0  ;;  %vm1712_vm1 = vcmp.gt.f32.partialorder %v3003_v21, 20.0 }
 0x2ae   : > { %v1725_v44 = vsel %vm1709_vm12, %v1446_v63, %v1693_v0 }
 0x2af   : > { %v1523_v60 = vmul.f32 1.442695, %v1504_v7 }
 0x2b0   : > { %v2241_v1 = vpop.eup %2240  ;;  %v1455_v51 = vpop.f32.mrf.mxu3 }
 0x2b1   : > { %v2243_v52 = vpop.eup %2242  ;;  %v1560_v32 = vmul.f32 0.6931472, %v2241_v1  ;;  %2244 = vpow2.f32 %v1523_v60  ;;  %v3007_v12 = vadd.f32 %v2982_v19, %v1455_v51 }
 0x2b2   : > { %v1567_v6 = vadd.f32 1.0, %v2243_v52  ;;  %v1570_v49 = vmul.f32 -0.5, %v2243_v52  ;;  %v1573_v38 = vand.u32 2147483647, %v2243_v52 }
 0x2b3   : > { %v1566_v59 = vsel %vm1565_vm11, %v1563_v62, %v1560_v32  ;;  %v3010_v42 = vmul.f32 100.0, %v3007_v12 }
 0x2b4   : > { %v1694_v5 = vmul.f32 0.01, %v1566_v59  ;;  %2246 = vlog2.f32 %v1567_v6  ;;  %v1571_v43 = vadd.f32 1.0, %v1570_v49  ;;  %vm1574_vm14 = vcmp.lt.f32.partialorder %v1573_v38, 0.0004427343 }
 0x2b5   : > { %v1505_v36 = vmin.f32 %v3010_v42, 20.0  ;;  %vm1713_vm4 = vcmp.gt.f32.partialorder %v3010_v42, 20.0 }
 0x2b6   : > { %v1726_v31 = vsel %vm1710_vm13, %v1448_v23, %v1694_v5  ;;  %v1572_v63 = vmul.f32 %v2243_v52, %v1571_v43 }
 0x2b7   : > { %v1741_v33 = vpack.c.bf16 %v1726_v31, %v1725_v44  ;;  %v2245_v28 = vpop.eup %2244  ;;  %v1525_v11 = vmul.f32 1.442695, %v1505_v36 }
 0x2b8   : > { %v1457_v48 = vpop.f32.mrf.mxu3  ;;  %v1576_v54 = vadd.f32 1.0, %v2245_v28  ;;  %v1579_v56 = vmul.f32 -0.5, %v2245_v28  ;;  %v1582_v18 = vand.u32 2147483647, %v2245_v28 }
 0x2b9   : > { %2006 = vmatmul.msk.bf16.vlgmr.msrb.gmra.mxu0 %vm613_vm5, %v1741_v33  ;;  %2248 = vpow2.f32 %v1525_v11  ;;  %v3015_v4 = vadd.f32 %v2982_v19, %v1457_v48 }
 0x2ba   : > { %v2247_v35 = vpop.eup %2246  ;;  %2250 = vlog2.f32 %v1576_v54  ;;  %v1580_v16 = vadd.f32 1.0, %v1579_v56  ;;  %vm1583_vm15 = vcmp.lt.f32.partialorder %v1582_v18, 0.0004427343 }
 0x2bb   : > { %v3018_v20 = vmul.f32 100.0, %v3015_v4  ;;  %v1569_v13 = vmul.f32 0.6931472, %v2247_v35 }
 0x2bc   : > { %v1581_v39 = vmul.f32 %v2245_v28, %v1580_v16 }
 0x2bd   : > { %v1506_v8 = vmin.f32 %v3018_v20, 20.0  ;;  %v1575_v50 = vsel %vm1574_vm14, %v1572_v63, %v1569_v13  ;;  %vm1714_vm6 = vcmp.gt.f32.partialorder %v3018_v20, 20.0 }
 0x2be   : > { %v1695_v37 = vmul.f32 0.01, %v1575_v50 }
 0x2bf   : > { %v2249_v15 = vpop.eup %2248  ;;  %v1527_v40 = vmul.f32 1.442695, %v1506_v8 }
 0x2c0   : > { %v2251_v23 = vpop.eup %2250  ;;  %v1460_v53 = vpop.f32.mrf.mxu3  ;;  %v1585_v25 = vadd.f32 1.0, %v2249_v15  ;;  %v1588_v55 = vmul.f32 -0.5, %v2249_v15  ;;  %v1727_v26 = vsel %vm1711_vm0, %v2993_v2, %v1695_v37  ;;  %v1591_v45 = vand.u32 2147483647, %v2249_v15 }
 0x2c1   : > { %2252 = vpow2.f32 %v1527_v40  ;;  %v3022_v24 = vadd.f32 %v2982_v19, %v1460_v53  ;;  %v1578_v58 = vmul.f32 0.6931472, %v2251_v23 }
 0x2c2   : > { %2254 = vlog2.f32 %v1585_v25  ;;  %v1589_v57 = vadd.f32 1.0, %v1588_v55  ;;  %vm1592_vm2 = vcmp.lt.f32.partialorder %v1591_v45, 0.0004427343 }
 0x2c3   : > { %v3025_v30 = vmul.f32 100.0, %v3022_v24  ;;  %v1584_v61 = vsel %vm1583_vm15, %v1581_v39, %v1578_v58 }
 0x2c4   : > { %v1696_v46 = vmul.f32 0.01, %v1584_v61  ;;  %v1590_v7 = vmul.f32 %v2249_v15, %v1589_v57 }
 0x2c5   : > { %v1507_v34 = vmin.f32 %v3025_v30, 20.0  ;;  %vm1715_vm9 = vcmp.gt.f32.partialorder %v3025_v30, 20.0 }
 0x2c6   : > { %v1728_v3 = vsel %vm1712_vm1, %v3000_v47, %v1696_v46 }
 0x2c7   : > { %v2253_v27 = vpop.eup %2252  ;;  %v1529_v29 = vmul.f32 1.442695, %v1507_v34  ;;  %v1742_v9 = vpack.c.bf16 %v1728_v3, %v1727_v26 }
 0x2c8   : > { %v2255_v41 = vpop.eup %2254  ;;  %v1462_v22 = vpop.f32.mrf.mxu3  ;;  %v1594_v14 = vadd.f32 1.0, %v2253_v27  ;;  %v1597_v21 = vmul.f32 -0.5, %v2253_v27  ;;  %v1600_v52 = vand.u32 2147483647, %v2253_v27 }
 0x2c9   : > { %2256 = vpow2.f32 %v1529_v29  ;;  %v3033_v17 = vadd.f32 %v2982_v19, %v1462_v22  ;;  %2007 = vmatmul.msk.bf16.gmra.mxu0 %vm613_vm5, %v1742_v9  ;;  %v1587_v47 = vmul.f32 0.6931472, %v2255_v41 }
 0x2ca   : > { %2258 = vlog2.f32 %v1594_v14  ;;  %v1598_v1 = vadd.f32 1.0, %v1597_v21  ;;  %vm1601_vm3 = vcmp.lt.f32.partialorder %v1600_v52, 0.0004427343 }
 0x2cb   : > { %v3037_v2 = vmul.f32 100.0, %v3033_v17  ;;  %v1593_v60 = vsel %vm1592_vm2, %v1590_v7, %v1587_v47 }
 0x2cc   : > { %v1599_v44 = vmul.f32 %v2253_v27, %v1598_v1  ;;  %v1697_v31 = vmul.f32 0.01, %v1593_v60 }
 0x2cd   : > { %v1508_v10 = vmin.f32 %v3037_v2, 20.0  ;;  %vm1716_vm10 = vcmp.gt.f32.partialorder %v3037_v2, 20.0 }
 0x2ce   : > { %v1729_v35 = vsel %vm1713_vm4, %v3007_v12, %v1697_v31 }
 0x2cf   : > { %v2257_v32 = vpop.eup %2256  ;;  %v1531_v62 = vmul.f32 1.442695, %v1508_v10 }
 0x2d0   : > { %v2259_v0 = vpop.eup %2258  ;;  %v1465_v51 = vpop.f32.mrf.mxu3  ;;  %v1603_v6 = vadd.f32 1.0, %v2257_v32  ;;  %v1606_v11 = vmul.f32 -0.5, %v2257_v32  ;;  %v1609_v16 = vand.u32 2147483647, %v2257_v32 }
 0x2d1   : > { %2260 = vpow2.f32 %v1531_v62  ;;  %v3041_v59 = vadd.f32 %v2982_v19, %v1465_v51  ;;  %v1596_v5 = vmul.f32 0.6931472, %v2259_v0 }
 0x2d2   : > { %2262 = vlog2.f32 %v1603_v6  ;;  %v1607_v42 = vadd.f32 1.0, %v1606_v11  ;;  %vm1610_vm7 = vcmp.lt.f32.partialorder %v1609_v16, 0.0004427343 }
 0x2d3   : > { %v3044_v33 = vmul.f32 100.0, %v3041_v59  ;;  %v1602_v36 = vsel %vm1601_vm3, %v1599_v44, %v1596_v5 }
 0x2d4   : > { %v1698_v49 = vmul.f32 0.01, %v1602_v36  ;;  %v1608_v15 = vmul.f32 %v2257_v32, %v1607_v42 }
 0x2d5   : > { %v1509_v28 = vmin.f32 %v3044_v33, 20.0  ;;  %vm1717_vm13 = vcmp.gt.f32.partialorder %v3044_v33, 20.0 }
 0x2d6   : > { %v1730_v48 = vsel %vm1714_vm6, %v3015_v4, %v1698_v49 }
 0x2d7   : > { %v2261_v54 = vpop.eup %2260  ;;  %v1533_v43 = vmul.f32 1.442695, %v1509_v28  ;;  %v1743_v56 = vpack.c.bf16 %v1730_v48, %v1729_v35 }
 0x2d8   : > { %v2263_v38 = vpop.eup %2262  ;;  %v1467_v13 = vpop.f32.mrf.mxu3  ;;  %v1612_v8 = vadd.f32 1.0, %v2261_v54  ;;  %v1615_v20 = vmul.f32 -0.5, %v2261_v54  ;;  %v1618_v50 = vand.u32 2147483647, %v2261_v54 }
 0x2d9   : > { %2264 = vpow2.f32 %v1533_v43  ;;  %v3052_v63 = vadd.f32 %v2982_v19, %v1467_v13  ;;  %2008 = vmatmul.msk.bf16.gmra.mxu0 %vm613_vm5, %v1743_v56  ;;  %v1605_v4 = vmul.f32 0.6931472, %v2263_v38 }
 0x2da   : > { %2266 = vlog2.f32 %v1612_v8  ;;  %v1616_v40 = vadd.f32 1.0, %v1615_v20  ;;  %vm1619_vm8 = vcmp.lt.f32.partialorder %v1618_v50, 0.0004427343 }
 0x2db   : > { %v3056_v12 = vmul.f32 100.0, %v3052_v63  ;;  %v1611_v25 = vsel %vm1610_vm7, %v1608_v15, %v1605_v4 }
 0x2dc   : > { %v1617_v34 = vmul.f32 %v2261_v54, %v1616_v40  ;;  %v1699_v55 = vmul.f32 0.01, %v1611_v25 }
 0x2dd   : > { %v1510_v18 = vmin.f32 %v3056_v12, 20.0  ;;  %vm1718_vm14 = vcmp.gt.f32.partialorder %v3056_v12, 20.0 }
 0x2de   : > { %v1731_v41 = vsel %vm1715_vm9, %v3022_v24, %v1699_v55 }
 0x2df   : > { %v2265_v23 = vpop.eup %2264  ;;  %v1535_v53 = vmul.f32 1.442695, %v1510_v18 }
 0x2e0   : > { %v2267_v58 = vpop.eup %2266  ;;  %v1470_v39 = vpop.f32.mrf.mxu3  ;;  %v1621_v37 = vadd.f32 1.0, %v2265_v23  ;;  %v1624_v9 = vmul.f32 -0.5, %v2265_v23  ;;  %v1627_v1 = vand.u32 2147483647, %v2265_v23 }
 0x2e1   : > { %2268 = vpow2.f32 %v1535_v53  ;;  %v3060_v61 = vadd.f32 %v2982_v19, %v1470_v39  ;;  %v1614_v46 = vmul.f32 0.6931472, %v2267_v58 }
 0x2e2   : > { %2270 = vlog2.f32 %v1621_v37  ;;  %v1625_v30 = vadd.f32 1.0, %v1624_v9  ;;  %vm1628_vm11 = vcmp.lt.f32.partialorder %v1627_v1, 0.0004427343 }
 0x2e3   : > { %v3063_v26 = vmul.f32 100.0, %v3060_v61  ;;  %v1620_v3 = vsel %vm1619_vm8, %v1617_v34, %v1614_v46 }
 0x2e4   : > { %v1700_v27 = vmul.f32 0.01, %v1620_v3  ;;  %v1626_v32 = vmul.f32 %v2265_v23, %v1625_v30 }
 0x2e5   : > { %v1511_v29 = vmin.f32 %v3063_v26, 20.0  ;;  %vm1719_vm1 = vcmp.gt.f32.partialorder %v3063_v26, 20.0 }
 0x2e6   : > { %v1732_v22 = vsel %vm1716_vm10, %v3033_v17, %v1700_v27 }
 0x2e7   : > { %v2269_v14 = vpop.eup %2268  ;;  %v1537_v57 = vmul.f32 1.442695, %v1511_v29  ;;  %v1744_v21 = vpack.c.bf16 %v1732_v22, %v1731_v41 }
 0x2e8   : > { %v2271_v45 = vpop.eup %2270  ;;  %v1472_v47 = vpop.f32.mrf.mxu3  ;;  %v1630_v10 = vadd.f32 1.0, %v2269_v14  ;;  %v1633_v2 = vmul.f32 -0.5, %v2269_v14  ;;  %v1636_v60 = vand.u32 2147483647, %v2269_v14 }
 0x2e9   : > { %2272 = vpow2.f32 %v1537_v57  ;;  %v3071_v7 = vadd.f32 %v2982_v19, %v1472_v47  ;;  %2009 = vmatmul.msk.bf16.gmra.mxu0 %vm613_vm5, %v1744_v21  ;;  %v1623_v17 = vmul.f32 0.6931472, %v2271_v45 }
 0x2ea   : > { %2274 = vlog2.f32 %v1630_v10  ;;  %v1634_v62 = vadd.f32 1.0, %v1633_v2  ;;  %vm1637_vm12 = vcmp.lt.f32.partialorder %v1636_v60, 0.0004427343 }
 0x2eb   : > { %v3075_v24 = vmul.f32 100.0, %v3071_v7  ;;  %v1629_v6 = vsel %vm1628_vm11, %v1626_v32, %v1623_v17 }
 0x2ec   : > { %v1635_v28 = vmul.f32 %v2269_v14, %v1634_v62  ;;  %v1701_v11 = vmul.f32 0.01, %v1629_v6 }
 0x2ed   : > { %v1512_v52 = vmin.f32 %v3075_v24, 20.0  ;;  %vm1720_vm2 = vcmp.gt.f32.partialorder %v3075_v24, 20.0 }
 0x2ee   : > { %v1733_v38 = vsel %vm1717_vm13, %v3041_v59, %v1701_v11 }
 0x2ef   : > { %v2273_v0 = vpop.eup %2272  ;;  %v1539_v51 = vmul.f32 1.442695, %v1512_v52 }
 0x2f0   : > { %v2275_v5 = vpop.eup %2274  ;;  %v1475_v44 = vpop.f32.mrf.mxu3  ;;  %v1639_v31 = vadd.f32 1.0, %v2273_v0  ;;  %v1642_v56 = vmul.f32 -0.5, %v2273_v0  ;;  %v1645_v40 = vand.u32 2147483647, %v2273_v0 }
 0x2f1   : > { %2276 = vpow2.f32 %v1539_v51  ;;  %v3079_v36 = vadd.f32 %v2982_v19, %v1475_v44  ;;  %v1632_v49 = vmul.f32 0.6931472, %v2275_v5 }
 0x2f2   : > { %2278 = vlog2.f32 %v1639_v31  ;;  %v1643_v33 = vadd.f32 1.0, %v1642_v56  ;;  %vm1646_vm15 = vcmp.lt.f32.partialorder %v1645_v40, 0.0004427343 }
 0x2f3   : > { %v3082_v35 = vmul.f32 100.0, %v3079_v36  ;;  %v1638_v48 = vsel %vm1637_vm12, %v1635_v28, %v1632_v49  ;;  %vm1844_vm12 = vcmask 72704  }
 0x2f4   : > { %v1702_v54 = vmul.f32 0.01, %v1638_v48  ;;  %v1644_v23 = vmul.f32 %v2273_v0, %v1643_v33 }
 0x2f5   : > { %v1513_v43 = vmin.f32 %v3082_v35, 20.0  ;;  %vm1721_vm6 = vcmp.gt.f32.partialorder %v3082_v35, 20.0 }
 0x2f6   : > { %v1734_v13 = vsel %vm1718_vm14, %v3052_v63, %v1702_v54 }
 0x2f7   : > { %v2277_v8 = vpop.eup %2276  ;;  %v1541_v42 = vmul.f32 1.442695, %v1513_v43  ;;  %v1745_v20 = vpack.c.bf16 %v1734_v13, %v1733_v38 }
 0x2f8   : > { %v2279_v16 = vpop.eup %2278  ;;  %v1477_v4 = vpop.f32.mrf.mxu3  ;;  %v1648_v18 = vadd.f32 1.0, %v2277_v8  ;;  %v1651_v12 = vmul.f32 -0.5, %v2277_v8  ;;  %v1654_v25 = vand.u32 2147483647, %v2277_v8 }
 0x2f9   : > { %2280 = vpow2.f32 %v1541_v42  ;;  %v3090_v15 = vadd.f32 %v2982_v19, %v1477_v4  ;;  %2010 = vmatmul.msk.bf16.gmra.mxu0 %vm613_vm5, %v1745_v20  ;;  %v1641_v63 = vmul.f32 0.6931472, %v2279_v16 }
 0x2fa   : > { %2282 = vlog2.f32 %v1648_v18  ;;  %v1652_v53 = vadd.f32 1.0, %v1651_v12  ;;  %vm1655_vm0 = vcmp.lt.f32.partialorder %v1654_v25, 0.0004427343 }
 0x2fb   : > { %v3094_v59 = vmul.f32 100.0, %v3090_v15  ;;  %v1647_v37 = vsel %vm1646_vm15, %v1644_v23, %v1641_v63 }
 0x2fc   : > { %v1653_v29 = vmul.f32 %v2277_v8, %v1652_v53  ;;  %v1703_v9 = vmul.f32 0.01, %v1647_v37 }
 0x2fd   : > { %v1514_v50 = vmin.f32 %v3094_v59, 20.0  ;;  %vm1722_vm7 = vcmp.gt.f32.partialorder %v3094_v59, 20.0 }
 0x2fe   : > { %v1735_v45 = vsel %vm1719_vm1, %v3060_v61, %v1703_v9 }
 0x2ff   : > { %v2281_v58 = vpop.eup %2280  ;;  %v1543_v39 = vmul.f32 1.442695, %v1514_v50 }
 0x300   : > { %v2283_v46 = vpop.eup %2282  ;;  %v1480_v34 = vpop.f32.mrf.mxu3  ;;  %v1657_v55 = vadd.f32 1.0, %v2281_v58  ;;  %v1660_v21 = vmul.f32 -0.5, %v2281_v58  ;;  %v1663_v62 = vand.u32 2147483647, %v2281_v58 }
 0x301   : > { %2284 = vpow2.f32 %v1543_v39  ;;  %v3098_v3 = vadd.f32 %v2982_v19, %v1480_v34  ;;  %v1650_v27 = vmul.f32 0.6931472, %v2283_v46  ;;  %v2041_v46 = vld [vmem:[%s3166_s3 + $0x4] ss:$0 sm:$0xff] }
 0x302   : > { %2286 = vlog2.f32 %v1657_v55  ;;  %v1661_v26 = vadd.f32 1.0, %v1660_v21  ;;  %vm1664_vm3 = vcmp.lt.f32.partialorder %v1663_v62, 0.0004427343 }
 0x303   : > { %v3101_v41 = vmul.f32 100.0, %v3098_v3  ;;  %v1656_v22 = vsel %vm1655_vm0, %v1653_v29, %v1650_v27 }
 0x304   : > { %v1704_v14 = vmul.f32 0.01, %v1656_v22  ;;  %v1662_v51 = vmul.f32 %v2281_v58, %v1661_v26 }
 0x305   : > { %v1515_v57 = vmin.f32 %v3101_v41, 20.0  ;;  %vm1723_vm10 = vcmp.gt.f32.partialorder %v3101_v41, 20.0 }
 0x306   : > { %v1736_v47 = vsel %vm1720_vm2, %v3071_v7, %v1704_v14 }
 0x307   : > { %v2285_v10 = vpop.eup %2284  ;;  %v1545_v30 = vmul.f32 1.442695, %v1515_v57  ;;  %v1746_v2 = vpack.c.bf16 %v1736_v47, %v1735_v45 }
 0x308   : > { %v2287_v1 = vpop.eup %2286  ;;  %v1482_v17 = vpop.f32.mrf.mxu3  ;;  %v1666_v52 = vadd.f32 1.0, %v2285_v10  ;;  %v1669_v24 = vmul.f32 -0.5, %v2285_v10  ;;  %v1672_v6 = vand.u32 2147483647, %v2285_v10 }
 0x309   : > { %2288 = vpow2.f32 %v1545_v30  ;;  %v1483_v32 = vadd.f32 %v2982_v19, %v1482_v17  ;;  %2011 = vmatmul.msk.bf16.gmra.mxu0 %vm613_vm5, %v1746_v2  ;;  %v1659_v0 = vmul.f32 0.6931472, %v2287_v1 }
 0x30a   : > { %2290 = vlog2.f32 %v1666_v52  ;;  %v1670_v7 = vadd.f32 1.0, %v1669_v24  ;;  %vm1673_vm4 = vcmp.lt.f32.partialorder %v1672_v6, 0.0004427343 }
 0x30b   : > { %v1500_v60 = vmul.f32 100.0, %v1483_v32  ;;  %v1665_v31 = vsel %vm1664_vm3, %v1662_v51, %v1659_v0 }
 0x30c   : > { %v1671_v11 = vmul.f32 %v2285_v10, %v1670_v7  ;;  %v1705_v48 = vmul.f32 0.01, %v1665_v31 }
 0x30d   : > { %v1516_v61 = vmin.f32 %v1500_v60, 20.0  ;;  %vm1724_vm11 = vcmp.gt.f32.partialorder %v1500_v60, 20.0 }
 0x30e   : > { %v1737_v38 = vsel %vm1721_vm6, %v3079_v36, %v1705_v48 }
 0x30f   : > { %v2289_v5 = vpop.eup %2288  ;;  %v1547_v44 = vmul.f32 1.442695, %v1516_v61 }
 0x310   : > { %v2291_v49 = vpop.eup %2290  ;;  %v1675_v28 = vadd.f32 1.0, %v2289_v5  ;;  %v1678_v56 = vmul.f32 -0.5, %v2289_v5  ;;  %v1681_v33 = vand.u32 2147483647, %v2289_v5 }
 0x311   : > { %2292 = vpow2.f32 %v1547_v44  ;;  %v1668_v19 = vmul.f32 0.6931472, %v2291_v49 }
 0x312   : > { %2294 = vlog2.f32 %v1675_v28  ;;  %v1679_v4 = vadd.f32 1.0, %v1678_v56  ;;  %vm1682_vm8 = vcmp.lt.f32.partialorder %v1681_v33, 0.0004427343 }
 0x313   : > { %v1674_v54 = vsel %vm1673_vm4, %v1671_v11, %v1668_v19 }
 0x314   : > { %v1706_v43 = vmul.f32 0.01, %v1674_v54  ;;  %v1680_v40 = vmul.f32 %v2289_v5, %v1679_v4 }
 0x316   : > { %v1738_v13 = vsel %vm1722_vm7, %v3090_v15, %v1706_v43 }
 0x317   : > { %v2293_v8 = vpop.eup %2292  ;;  %v1747_v42 = vpack.c.bf16 %v1738_v13, %v1737_v38 }
 0x318   : > { %v2295_v20 = vpop.eup %2294  ;;  %v1684_v16 = vadd.f32 1.0, %v2293_v8  ;;  %v1687_v18 = vmul.f32 -0.5, %v2293_v8  ;;  %v1690_v59 = vand.u32 2147483647, %v2293_v8 }
 0x319   : > { %2012 = vmatmul.msk.bf16.gmra.mxu0 %vm613_vm5, %v1747_v42  ;;  %v1677_v12 = vmul.f32 0.6931472, %v2295_v20 }
 0x31a   : > { %2296 = vlog2.f32 %v1684_v16  ;;  %v1688_v35 = vadd.f32 1.0, %v1687_v18  ;;  %vm1691_vm9 = vcmp.lt.f32.partialorder %v1690_v59, 0.0004427343 }
 0x31b   : > { %v1683_v63 = vsel %vm1682_vm8, %v1680_v40, %v1677_v12 }
 0x31c   : > { %v1689_v15 = vmul.f32 %v2293_v8, %v1688_v35  ;;  %v1707_v23 = vmul.f32 0.01, %v1683_v63 }
 0x31e   : > { %v1739_v58 = vsel %vm1723_vm10, %v3098_v3, %v1707_v23 }
 0x320   : > { %v2297_v36 = vpop.eup %2296 }
 0x321   : > { %v1686_v50 = vmul.f32 0.6931472, %v2297_v36 }
 0x323   : > { %v1692_v53 = vsel %vm1691_vm9, %v1689_v15, %v1686_v50 }
 0x324   : > { %v1708_v25 = vmul.f32 0.01, %v1692_v53 }
 0x326   : > { %v1740_v39 = vsel %vm1724_vm11, %v1483_v32, %v1708_v25 }
 0x327   : > { %v1748_v37 = vpack.c.bf16 %v1740_v39, %v1739_v58 }
 0x329   : > { %2013 = vmatmul.msk.bf16.gmra.mxu0 %vm613_vm5, %v1748_v37 }
 0x336   : > { %v1804_v34 = vpop.f32.mrf.mxu0 }
 0x337   : > { %v1805_v55 = vadd.f32 %v2041_v46, %v1804_v34 }
 0x339   : > { %1845 = vst.msk [vmem:[%s3126_s30] sm:$0xff] %vm1844_vm12, %v1805_v55 }
 0x33e   : > { %v1806_v3 = vpop.f32.mrf.mxu0 }
 0x33f   : > { %v1807_v27 = vadd.f32 %v2041_v46, %v1806_v3 }
 0x341   : > { %1846 = vst.msk [vmem:[%s3126_s30 + $0x8] sm:$0xff] %vm1844_vm12, %v1807_v27 }
 0x346   : > { %v1809_v29 = vpop.f32.mrf.mxu0 }
 0x347   : > { %v1810_v9 = vadd.f32 %v2041_v46, %v1809_v29 }
 0x349   : > { %1847 = vst.msk [vmem:[%s3126_s30 + $0x10] sm:$0xff] %vm1844_vm12, %v1810_v9 }
 0x34e   : > { %v1811_v41 = vpop.f32.mrf.mxu0 }
 0x34f   : > { %v1812_v22 = vadd.f32 %v2041_v46, %v1811_v41 }
 0x351   : > { %1848 = vst.msk [vmem:[%s3126_s30 + $0x18] sm:$0xff] %vm1844_vm12, %v1812_v22 }
 0x356   : > { %v1814_v14 = vpop.f32.mrf.mxu0 }
 0x357   : > { %v1815_v57 = vadd.f32 %v2041_v46, %v1814_v14 }
 0x359   : > { %1849 = vst.msk [vmem:[%s3126_s30 + $0x20] sm:$0xff] %vm1844_vm12, %v1815_v57 }
 0x35e   : > { %v1816_v21 = vpop.f32.mrf.mxu0 }
 0x35f   : > { %v1817_v45 = vadd.f32 %v2041_v46, %v1816_v21 }
 0x361   : > { %1850 = vst.msk [vmem:[%s3126_s30 + $0x28] sm:$0xff] %vm1844_vm12, %v1817_v45 }
 0x366   : > { %v1819_v47 = vpop.f32.mrf.mxu0 }
 0x367   : > { %v1820_v10 = vadd.f32 %v2041_v46, %v1819_v47 }
 0x369   : > { %1851 = vst.msk [vmem:[%s3126_s30 + $0x30] sm:$0xff] %vm1844_vm12, %v1820_v10 }
 0x36e   : > { %v1821_v30 = vpop.f32.mrf.mxu0 }
 0x36f   : > { %v1822_v2 = vadd.f32 %v2041_v46, %v1821_v30 }
 0x371   : > { %1852 = vst.msk [vmem:[%s3126_s30 + $0x38] sm:$0xff] %vm1844_vm12, %v1822_v2 }
 0x376   : > { %v1824_v1 = vpop.f32.mrf.mxu0 }
 0x377   : > { %v1825_v17 = vadd.f32 %v2041_v46, %v1824_v1 }
 0x379   : > { %1853 = vst.msk [vmem:[%s3126_s30 + $0x40] sm:$0xff] %vm1844_vm12, %v1825_v17 }
 0x37e   : > { %v1826_v52 = vpop.f32.mrf.mxu0 }
 0x37f   : > { %v1827_v32 = vadd.f32 %v2041_v46, %v1826_v52 }
 0x381   : > { %1854 = vst.msk [vmem:[%s3126_s30 + $0x48] sm:$0xff] %vm1844_vm12, %v1827_v32 }
 0x386   : > { %v1829_v26 = vpop.f32.mrf.mxu0 }
 0x387   : > { %v1830_v24 = vadd.f32 %v2041_v46, %v1829_v26 }
 0x389   : > { %1855 = vst.msk [vmem:[%s3126_s30 + $0x50] sm:$0xff] %vm1844_vm12, %v1830_v24 }
 0x38e   : > { %v1831_v62 = vpop.f32.mrf.mxu0 }
 0x38f   : > { %v1832_v60 = vadd.f32 %v2041_v46, %v1831_v62 }
 0x391   : > { %1856 = vst.msk [vmem:[%s3126_s30 + $0x58] sm:$0xff] %vm1844_vm12, %v1832_v60 }
 0x396   : > { %v1834_v0 = vpop.f32.mrf.mxu0 }
 0x397   : > { %v1835_v61 = vadd.f32 %v2041_v46, %v1834_v0 }
 0x399   : > { %1857 = vst.msk [vmem:[%s3126_s30 + $0x60] sm:$0xff] %vm1844_vm12, %v1835_v61 }
 0x39e   : > { %v1836_v51 = vpop.f32.mrf.mxu0 }
 0x39f   : > { %v1837_v7 = vadd.f32 %v2041_v46, %v1836_v51 }
 0x3a1   : > { %1858 = vst.msk [vmem:[%s3126_s30 + $0x68] sm:$0xff] %vm1844_vm12, %v1837_v7 }
 0x3a6   : > { %v1839_v6 = vpop.f32.mrf.mxu0 }
 0x3a7   : > { %v1840_v5 = vadd.f32 %v2041_v46, %v1839_v6 }
 0x3a9   : > { %1859 = vst.msk [vmem:[%s3126_s30 + $0x70] sm:$0xff] %vm1844_vm12, %v1840_v5 }
 0x3ae   : > { %v1841_v44 = vpop.f32.mrf.mxu0 }
 0x3af   : > { %v1842_v31 = vadd.f32 %v2041_v46, %v1841_v44 }
 0x3b1   : > { %1860 = vst.msk [vmem:[%s3126_s30 + $0x78] sm:$0xff] %vm1844_vm12, %v1842_v31 }
 0x3b2 PF: > { %s14_s15 = sadd.s32 1, %s2304_s15  }
 0x3b3   : > { %p11_p4 = scmp.ge.s32.totalorder %s14_s15, 4  }
 0x3b5   :  { %13 = sbr.rel (!%p11_p4) target bundleno = 1 (0x1), region = 73 }

</bundles_post_ra>
